<compile_context>
chip_gen: v6e
topology: v6e:2x2x1
jax: 0.10.0
libtpu: 0.0.40
codegen_flags: <defaults>
</compile_context>

<pallas_src>
import numpy as np
import jax
import jax.numpy as jnp
from jax.experimental import pallas as pl
from jax.experimental.pallas import tpu as pltpu

_VMEM_LIMIT = 32 * 1024 * 1024


# ----------------------- ConvTranspose2d(2, 2, stride=2) kernel ----------------------- #

def _deconv2x2_kernel(x_ref, w_ref, b_ref, o_ref):
    # (4*Cup, Cin) @ (Cin, H*W) on the MXU (bf16 operands, f32 accumulation);
    # bias add in f32 on the VPU; store bf16 with the spatial dim lane-dense.
    y = jnp.dot(w_ref[...], x_ref[0, :, :], preferred_element_type=jnp.float32)
    y = y + b_ref[...]
    o_ref[0, :, :] = y.astype(o_ref.dtype)


def deconv2x2_s2(x_flat, w4, b4):
    """x_flat: (N, Cin, H*W) bf16; w4: (4*Cup, Cin) bf16; b4: (4*Cup, 1) f32.
    Returns (N, 4*Cup, H*W) bf16 where row (ki*2+kj)*Cup + co is subpixel phase (ki, kj)."""
    n, cin, hw = x_flat.shape
    c4 = w4.shape[0]
    cost = pl.CostEstimate(
        flops=int(2 * c4 * cin * n * hw),
        transcendentals=0,
        bytes_accessed=int(x_flat.size * 2 + w4.size * 2 + b4.size * 4 + n * c4 * hw * 2))
    return pl.pallas_call(
        _deconv2x2_kernel,
        out_shape=jax.ShapeDtypeStruct((n, c4, hw), jnp.bfloat16),
        grid_spec=pltpu.PrefetchScalarGridSpec(
            num_scalar_prefetch=0,
            grid=(n,),                                   # >=2 parallel steps (v7x megacore)
            in_specs=[pl.BlockSpec((1, cin, hw), lambda i: (i, 0, 0)),
                      pl.BlockSpec((c4, cin), lambda i: (0, 0)),
                      pl.BlockSpec((c4, 1), lambda i: (0, 0))],
            out_specs=pl.BlockSpec((1, c4, hw), lambda i: (i, 0, 0)),
        ),
        compiler_params=pltpu.CompilerParams(
            dimension_semantics=("parallel",),
            vmem_limit_bytes=_VMEM_LIMIT),
        cost_estimate=cost,
    )(x_flat, w4, b4)


# ------------------------------- fused 3x3 conv kernel -------------------------------- #

def _make_conv3x3_kernel(n_src, wp, lout):
    """3x3 conv (+bias, +ReLU) over `n_src` channel-split inputs (fused concat).

    Each input arrives zero-padded and flattened to (C_s, Lp) per image with row stride
    Wp = W + 2.  Output position p = h*Wp + w needs input position p + ki*Wp + kj, so each
    tap is one contiguous lane-offset slice of the single VMEM-resident input: no im2col,
    every pixel read from HBM once.  Columns w >= W of the output rows are wrap-around
    garbage and are cropped by the wrapper."""
    def kernel(*refs):
        x_refs = refs[:n_src]
        w_refs = refs[n_src:2 * n_src]
        b_ref = refs[2 * n_src]
        o_ref = refs[2 * n_src + 1]
        cout = o_ref.shape[1]
        acc = jnp.zeros((cout, lout), jnp.float32)
        for s in range(n_src):
            x = x_refs[s][0, :, :]                        # (C_s, Lp) bf16, single load
            for ki in range(3):
                for kj in range(3):
                    t = ki * wp + kj
                    w_t = w_refs[s][ki, kj, :, :]         # (Cout, C_s) bf16
                    acc = acc + jnp.dot(w_t, x[:, t:t + lout],
                                        preferred_element_type=jnp.float32)
        y = jnp.maximum(acc + b_ref[...], 0.0)            # f32 bias + ReLU on the VPU
        o_ref[0, :, :] = y.astype(o_ref.dtype)
    return kernel


def conv3x3_relu(xs, ws, b, *, out_dtype):
    """Conv2d(3x3, padding=1) + ReLU with input channels split over `xs` (fused torch.cat):
    y = ReLU(b + sum_s conv(xs[s], ws[s])).

    xs[s]: (N, C_s, H, W); ws[s]: (Cout, C_s, 3, 3) (PyTorch layout); b: (Cout,)."""
    n, _, hin, win = xs[0].shape
    cout = ws[0].shape[0]
    wp = win + 2
    lp = (hin + 3) * wp          # pad H by (1, 2): the extra bottom row keeps tap slices in-bounds
    lout = hin * wp

    xs_flat, ws_k = [], []
    for x_s, w_s in zip(xs, ws):
        xp = jnp.pad(x_s.astype(jnp.bfloat16), ((0, 0), (0, 0), (1, 2), (1, 1)))
        xs_flat.append(xp.reshape(n, x_s.shape[1], lp))
        ws_k.append(jnp.transpose(w_s, (2, 3, 0, 1)).astype(jnp.bfloat16))  # (3,3,Cout,C_s)
    b2 = b.reshape(cout, 1).astype(jnp.float32)

    in_specs = (
        [pl.BlockSpec((1, int(xf.shape[1]), lp), lambda i: (i, 0, 0)) for xf in xs_flat]
        + [pl.BlockSpec(tuple(wk.shape), lambda i: (0, 0, 0, 0)) for wk in ws_k]
        + [pl.BlockSpec((cout, 1), lambda i: (0, 0))]
    )
    cost = pl.CostEstimate(
        flops=int(2 * cout * sum(9 * int(xv.shape[1]) for xv in xs) * n * hin * win),
        transcendentals=0,
        bytes_accessed=int(sum(xf.size * 2 for xf in xs_flat)
                           + sum(wk.size * 2 for wk in ws_k)
                           + cout * 4
                           + n * cout * lout * np.dtype(out_dtype).itemsize))
    y = pl.pallas_call(
        _make_conv3x3_kernel(len(xs), wp, lout),
        out_shape=jax.ShapeDtypeStruct((n, cout, lout), out_dtype),
        grid_spec=pltpu.PrefetchScalarGridSpec(
            num_scalar_prefetch=0,
            grid=(n,),                                   # >=2 parallel steps (v7x megacore)
            in_specs=in_specs,
            out_specs=pl.BlockSpec((1, cout, lout), lambda i: (i, 0, 0)),
        ),
        compiler_params=pltpu.CompilerParams(
            dimension_semantics=("parallel",),
            vmem_limit_bytes=_VMEM_LIMIT),
        cost_estimate=cost,
    )(*xs_flat, *ws_k, b2)
    # (N, Cout, H*Wp) -> (N, Cout, H, Wp) -> drop the 2 wrap-around garbage columns.
    return y.reshape(n, cout, hin, wp)[:, :, :, :win]


# ------------------------------------ Up.forward -------------------------------------- #

def _pad_or_crop_hw(x, p_left, p_right, p_top, p_bottom):
    """F.pad semantics on H/W of an NCHW tensor: negative pad crops, positive zero-pads."""
    h, w = x.shape[2], x.shape[3]
    x = x[:, :, max(0, -p_top):h - max(0, -p_bottom),
          max(0, -p_left):w - max(0, -p_right)]
    return jnp.pad(x, ((0, 0), (0, 0),
                       (max(0, p_top), max(0, p_bottom)),
                       (max(0, p_left), max(0, p_right))))


def up_forward(x, x_down, params):
    """Up.forward.  x: (N, Cin, H, W), x_down: (N, Cin//2, H2, W2); NCHW float32 in/out."""
    w_up, b_up, w1, b1, w2, b2 = params
    n, cin, h, w = x.shape
    cup = w_up.shape[1]

    # ConvTranspose2d(2, 2, stride=2): one (4*Cup, Cin) @ (Cin, H*W) matmul per image; the
    # four row groups are the 2x2 subpixel phases.
    x_flat = x.astype(jnp.bfloat16).reshape(n, cin, h * w)
    w4 = jnp.transpose(w_up, (2, 3, 1, 0)).reshape(4 * cup, cin).astype(jnp.bfloat16)
    b4 = jnp.tile(b_up, 4).reshape(4 * cup, 1).astype(jnp.float32)
    y4 = deconv2x2_s2(x_flat, w4, b4)                       # (N, 4*Cup, H*W) bf16

    # 2x2 pixel shuffle (stride-2 subpixel interleave; small XLA layout op).
    # TODO(synk): fold this scatter into the consumer conv's tap index math to save a pass.
    x_up = y4.reshape(n, 2, 2, cup, h, w)
    x_up = jnp.transpose(x_up, (0, 3, 4, 1, 5, 2)).reshape(n, cup, 2 * h, 2 * w)

    # Crop / pad the skip connection exactly like F.pad with possibly-negative pads.
    shape_diff = int(x_down.shape[2]) - int(x_up.shape[2])
    p_lt = (-shape_diff) // 2
    p_rb = -int(np.floor(shape_diff / 2))
    x_skip = _pad_or_crop_hw(x_down.astype(jnp.bfloat16), p_lt, p_rb, p_lt, p_rb)

    # Double conv; the channel concat is fused as split-K accumulation over two inputs.
    c_skip = x_skip.shape[1]
    h1 = conv3x3_relu([x_skip, x_up], [w1[:, :c_skip], w1[:, c_skip:]], b1,
                      out_dtype=jnp.bfloat16)
    h2 = conv3x3_relu([h1], [w2], b2, out_dtype=jnp.float32)
    return h2


# --------------------------------- numpy reference ------------------------------------ #

def _bf16(a):
    """Round an f32 array to bf16-representable values (mirrors the kernel's casts)."""
    return np.asarray(jnp.asarray(np.asarray(a, np.float32), jnp.bfloat16).astype(jnp.float32))


def _np_ref_up(x, x_down, params):
    w_up, b_up, w1, b1, w2, b2 = [np.asarray(p, np.float32) for p in params]
    x, x_down = _bf16(x), _bf16(x_down)
    w_up_r, w1_r, w2_r = _bf16(w_up), _bf16(w1), _bf16(w2)

    n, cin, h, w = x.shape
    cup = w_up.shape[1]
    x_up = np.zeros((n, cup, 2 * h, 2 * w), np.float32)
    for ki in range(2):
        for kj in range(2):
            x_up[:, :, ki::2, kj::2] = np.einsum('nchw,cd->ndhw', x, w_up_r[:, :, ki, kj])
    x_up += b_up[None, :, None, None]
    x_up = _bf16(x_up)                               # kernel stores x_up in bf16

    shape_diff = x_down.shape[2] - x_up.shape[2]
    pt = (-shape_diff) // 2
    pb = -int(np.floor(shape_diff / 2))
    hh, ww = x_down.shape[2], x_down.shape[3]
    xd = x_down[:, :, max(0, -pt):hh - max(0, -pb), max(0, -pt):ww - max(0, -pb)]
    xd = np.pad(xd, ((0, 0), (0, 0),
                     (max(0, pt), max(0, pb)), (max(0, pt), max(0, pb))))
    x_cat = np.concatenate([xd, x_up], axis=1)

    def conv3(xin, wgt, b):
        nn_, c, hh_, ww_ = xin.shape
        co = wgt.shape[0]
        xp = np.pad(xin, ((0, 0), (0, 0), (1, 1), (1, 1)))
        out = np.zeros((nn_, co, hh_, ww_), np.float32)
        for ki in range(3):
            for kj in range(3):
                out += np.einsum('nchw,dc->ndhw',
                                 xp[:, :, ki:ki + hh_, kj:kj + ww_], wgt[:, :, ki, kj])
        out += b[None, :, None, None]
        return np.maximum(out, 0.0)

    h1 = _bf16(conv3(x_cat, w1_r, b1))               # kernel stores conv1 output in bf16
    h2 = conv3(h1, w2_r, b2)
    return h2


# --------------------------------------- main ------------------------------------------ #

if __name__ == "__main__":
    in_channels, out_channels = 4, 4
    N, H, W = 2, 8, 8

    key = jax.random.PRNGKey(0)
    ks = jax.random.split(key, 8)
    x = jax.random.normal(ks[0], (N, in_channels, H, W), jnp.float32)
    x_down = jax.random.normal(ks[1], (N, in_channels // 2, 2 * H, 2 * W), jnp.float32)

    # Deterministic synthetic parameters (shapes follow the module __init__).
    w_up = 0.1 * jax.random.normal(ks[2], (in_channels, in_channels // 2, 2, 2), jnp.float32)
    b_up = 0.1 * jax.random.normal(ks[3], (in_channels // 2,), jnp.float32)
    w1 = 0.1 * jax.random.normal(ks[4], (out_channels, in_channels, 3, 3), jnp.float32)
    b1 = 0.1 * jax.random.normal(ks[5], (out_channels,), jnp.float32)
    w2 = 0.1 * jax.random.normal(ks[6], (out_channels, out_channels, 3, 3), jnp.float32)
    b2 = 0.1 * jax.random.normal(ks[7], (out_channels,), jnp.float32)
    params = (w_up, b_up, w1, b1, w2, b2)

    out = jax.jit(up_forward)(x, x_down, params)
    out = jax.block_until_ready(out)

    ref = _np_ref_up(np.asarray(x), np.asarray(x_down), params)
    assert out.shape == ref.shape, (out.shape, ref.shape)
    # bf16 operands / bf16 intermediates (mirrored in the reference) -> bf16-level tolerance.
    np.testing.assert_allclose(np.asarray(out, np.float32), ref, rtol=1e-2, atol=1e-2)
    print("KERNEL_OK")
</pallas_src>

<mosaic_0001>
module attributes {stable_mosaic.version = 11 : i64} {
  func.func @_deconv2x2_kernel(%arg0: i32, %arg1: memref<1x4x64xbf16, #tpu.memory_space<vmem>>, %arg2: memref<8x4xbf16, #tpu.memory_space<vmem>>, %arg3: memref<8x1xf32, #tpu.memory_space<vmem>>, %arg4: memref<1x8x64xbf16, #tpu.memory_space<vmem>>) attributes {dimension_semantics = [#tpu.dimension_semantics<parallel>], iteration_bounds = array<i64: 2>, scalar_prefetch = 0 : i64, scratch_operands = 0 : i64, tpu.core_type = #tpu.core_type<tc>, window_params = [{transform_indices = @transform_0, window_bounds = array<i64: 1, 4, 64>}, {pipeline_mode = #tpu.pipeline_mode<synchronous>, transform_indices = @transform_1, window_bounds = array<i64: 8, 4>}, {pipeline_mode = #tpu.pipeline_mode<synchronous>, transform_indices = @transform_2, window_bounds = array<i64: 8, 1>}, {transform_indices = @transform_3, window_bounds = array<i64: 1, 8, 64>}]} {
    %c0 = arith.constant 0 : index
    %c0_0 = arith.constant 0 : index
    %0 = vector.load %arg2[%c0, %c0_0] : memref<8x4xbf16, #tpu.memory_space<vmem>>, vector<8x4xbf16>
    %c0_1 = arith.constant 0 : index
    %c0_2 = arith.constant 0 : index
    %c0_3 = arith.constant 0 : index
    %1 = vector.load %arg1[%c0_1, %c0_2, %c0_3] : memref<1x4x64xbf16, #tpu.memory_space<vmem>>, vector<1x4x64xbf16>
    %2 = vector.shape_cast %1 : vector<1x4x64xbf16> to vector<4x64xbf16>
    %cst = arith.constant dense<0.000000e+00> : vector<8x64xf32>
    %3 = tpu.matmul %0, %2, %cst {dimension_numbers = #tpu.dot_dimension_numbers<[1], [0], [0], [1], [0, 0, 1, 1], [], []>} : vector<8x4xbf16>, vector<4x64xbf16>, vector<8x64xf32> -> vector<8x64xf32>
    %c0_4 = arith.constant 0 : index
    %c0_5 = arith.constant 0 : index
    %4 = vector.load %arg3[%c0_4, %c0_5] : memref<8x1xf32, #tpu.memory_space<vmem>>, vector<8x1xf32>
    %5 = vector.broadcast %4 : vector<8x1xf32> to vector<8x64xf32>
    %6 = arith.addf %3, %5 : vector<8x64xf32>
    %7 = arith.truncf %6 : vector<8x64xf32> to vector<8x64xbf16>
    %c0_6 = arith.constant 0 : index
    %c0_7 = arith.constant 0 : index
    %c0_8 = arith.constant 0 : index
    %8 = vector.load %arg4[%c0_6, %c0_7, %c0_8] : memref<1x8x64xbf16, #tpu.memory_space<vmem>>, vector<1x8x64xbf16>
    %9 = vector.shape_cast %8 : vector<1x8x64xbf16> to vector<8x64xbf16>
    %10 = vector.shape_cast %7 : vector<8x64xbf16> to vector<1x8x64xbf16>
    tpu.vector_store %arg4[%c0_6, %c0_7, %c0_8], %10 {strides = array<i32>} : memref<1x8x64xbf16, #tpu.memory_space<vmem>>, vector<1x8x64xbf16>,
    return
  }
  func.func @transform_0(%arg0: i32) -> (i32, i32, i32) {
    %c0_i32 = arith.constant 0 : i32
    %c0_i32_0 = arith.constant 0 : i32
    %c0_i32_1 = arith.constant 0 : i32
    return %arg0, %c0_i32, %c0_i32_0 : i32, i32, i32
  }
  func.func @transform_1(%arg0: i32) -> (i32, i32) {
    %c0_i32 = arith.constant 0 : i32
    %c0_i32_0 = arith.constant 0 : i32
    %c0_i32_1 = arith.constant 0 : i32
    return %c0_i32, %c0_i32_0 : i32, i32
  }
  func.func @transform_2(%arg0: i32) -> (i32, i32) {
    %c0_i32 = arith.constant 0 : i32
    %c0_i32_0 = arith.constant 0 : i32
    %c0_i32_1 = arith.constant 0 : i32
    return %c0_i32, %c0_i32_0 : i32, i32
  }
  func.func @transform_3(%arg0: i32) -> (i32, i32, i32) {
    %c0_i32 = arith.constant 0 : i32
    %c0_i32_0 = arith.constant 0 : i32
    %c0_i32_1 = arith.constant 0 : i32
    return %arg0, %c0_i32, %c0_i32_0 : i32, i32, i32
  }
}

module attributes {stable_mosaic.version = 11 : i64} {
  func.func @kernel(%arg0: i32, %arg1: memref<1x2x342xbf16, #tpu.memory_space<vmem>>, %arg2: memref<1x2x342xbf16, #tpu.memory_space<vmem>>, %arg3: memref<3x3x4x2xbf16, #tpu.memory_space<vmem>>, %arg4: memref<3x3x4x2xbf16, #tpu.memory_space<vmem>>, %arg5: memref<4x1xf32, #tpu.memory_space<vmem>>, %arg6: memref<1x4x288xbf16, #tpu.memory_space<vmem>>) attributes {dimension_semantics = [#tpu.dimension_semantics<parallel>], iteration_bounds = array<i64: 2>, scalar_prefetch = 0 : i64, scratch_operands = 0 : i64, tpu.core_type = #tpu.core_type<tc>, window_params = [{transform_indices = @transform_0, window_bounds = array<i64: 1, 2, 342>}, {transform_indices = @transform_1, window_bounds = array<i64: 1, 2, 342>}, {pipeline_mode = #tpu.pipeline_mode<synchronous>, transform_indices = @transform_2, window_bounds = array<i64: 3, 3, 4, 2>}, {pipeline_mode = #tpu.pipeline_mode<synchronous>, transform_indices = @transform_3, window_bounds = array<i64: 3, 3, 4, 2>}, {pipeline_mode = #tpu.pipeline_mode<synchronous>, transform_indices = @transform_4, window_bounds = array<i64: 4, 1>}, {transform_indices = @transform_5, window_bounds = array<i64: 1, 4, 288>}]} {
    %cst = arith.constant 0.000000e+00 : f32
    %0 = vector.broadcast %cst : f32 to vector<4x288xf32>
    %c0 = arith.constant 0 : index
    %c0_0 = arith.constant 0 : index
    %c0_1 = arith.constant 0 : index
    %1 = vector.load %arg1[%c0, %c0_0, %c0_1] : memref<1x2x342xbf16, #tpu.memory_space<vmem>>, vector<1x2x342xbf16>
    %2 = vector.shape_cast %1 : vector<1x2x342xbf16> to vector<2x342xbf16>
    %c0_2 = arith.constant 0 : index
    %c0_3 = arith.constant 0 : index
    %c0_4 = arith.constant 0 : index
    %c0_5 = arith.constant 0 : index
    %3 = vector.load %arg3[%c0_2, %c0_3, %c0_4, %c0_5] : memref<3x3x4x2xbf16, #tpu.memory_space<vmem>>, vector<1x1x4x2xbf16>
    %4 = vector.shape_cast %3 : vector<1x1x4x2xbf16> to vector<4x2xbf16>
    %5 = vector.extract_strided_slice %2 {offsets = [0, 0], sizes = [2, 288], strides = [1, 1]} : vector<2x342xbf16> to vector<2x288xbf16>
    %cst_6 = arith.constant dense<0.000000e+00> : vector<4x288xf32>
    %6 = tpu.matmul %4, %5, %cst_6 {dimension_numbers = #tpu.dot_dimension_numbers<[1], [0], [0], [1], [0, 0, 1, 1], [], []>} : vector<4x2xbf16>, vector<2x288xbf16>, vector<4x288xf32> -> vector<4x288xf32>
    %7 = arith.addf %0, %6 : vector<4x288xf32>
    %c0_7 = arith.constant 0 : index
    %c1 = arith.constant 1 : index
    %c0_8 = arith.constant 0 : index
    %c0_9 = arith.constant 0 : index
    %8 = vector.load %arg3[%c0_7, %c1, %c0_8, %c0_9] : memref<3x3x4x2xbf16, #tpu.memory_space<vmem>>, vector<1x1x4x2xbf16>
    %9 = vector.shape_cast %8 : vector<1x1x4x2xbf16> to vector<4x2xbf16>
    %10 = vector.extract_strided_slice %2 {offsets = [0, 1], sizes = [2, 288], strides = [1, 1]} : vector<2x342xbf16> to vector<2x288xbf16>
    %cst_10 = arith.constant dense<0.000000e+00> : vector<4x288xf32>
    %11 = tpu.matmul %9, %10, %cst_10 {dimension_numbers = #tpu.dot_dimension_numbers<[1], [0], [0], [1], [0, 0, 1, 1], [], []>} : vector<4x2xbf16>, vector<2x288xbf16>, vector<4x288xf32> -> vector<4x288xf32>
    %12 = arith.addf %7, %11 : vector<4x288xf32>
    %c0_11 = arith.constant 0 : index
    %c2 = arith.constant 2 : index
    %c0_12 = arith.constant 0 : index
    %c0_13 = arith.constant 0 : index
    %13 = vector.load %arg3[%c0_11, %c2, %c0_12, %c0_13] : memref<3x3x4x2xbf16, #tpu.memory_space<vmem>>, vector<1x1x4x2xbf16>
    %14 = vector.shape_cast %13 : vector<1x1x4x2xbf16> to vector<4x2xbf16>
    %15 = vector.extract_strided_slice %2 {offsets = [0, 2], sizes = [2, 288], strides = [1, 1]} : vector<2x342xbf16> to vector<2x288xbf16>
    %cst_14 = arith.constant dense<0.000000e+00> : vector<4x288xf32>
    %16 = tpu.matmul %14, %15, %cst_14 {dimension_numbers = #tpu.dot_dimension_numbers<[1], [0], [0], [1], [0, 0, 1, 1], [], []>} : vector<4x2xbf16>, vector<2x288xbf16>, vector<4x288xf32> -> vector<4x288xf32>
    %17 = arith.addf %12, %16 : vector<4x288xf32>
    %c1_15 = arith.constant 1 : index
    %c0_16 = arith.constant 0 : index
    %c0_17 = arith.constant 0 : index
    %c0_18 = arith.constant 0 : index
    %18 = vector.load %arg3[%c1_15, %c0_16, %c0_17, %c0_18] : memref<3x3x4x2xbf16, #tpu.memory_space<vmem>>, vector<1x1x4x2xbf16>
    %19 = vector.shape_cast %18 : vector<1x1x4x2xbf16> to vector<4x2xbf16>
    %20 = vector.extract_strided_slice %2 {offsets = [0, 18], sizes = [2, 288], strides = [1, 1]} : vector<2x342xbf16> to vector<2x288xbf16>
    %cst_19 = arith.constant dense<0.000000e+00> : vector<4x288xf32>
    %21 = tpu.matmul %19, %20, %cst_19 {dimension_numbers = #tpu.dot_dimension_numbers<[1], [0], [0], [1], [0, 0, 1, 1], [], []>} : vector<4x2xbf16>, vector<2x288xbf16>, vector<4x288xf32> -> vector<4x288xf32>
    %22 = arith.addf %17, %21 : vector<4x288xf32>
    %c1_20 = arith.constant 1 : index
    %c1_21 = arith.constant 1 : index
    %c0_22 = arith.constant 0 : index
    %c0_23 = arith.constant 0 : index
    %23 = vector.load %arg3[%c1_20, %c1_21, %c0_22, %c0_23] : memref<3x3x4x2xbf16, #tpu.memory_space<vmem>>, vector<1x1x4x2xbf16>
    %24 = vector.shape_cast %23 : vector<1x1x4x2xbf16> to vector<4x2xbf16>
    %25 = vector.extract_strided_slice %2 {offsets = [0, 19], sizes = [2, 288], strides = [1, 1]} : vector<2x342xbf16> to vector<2x288xbf16>
    %cst_24 = arith.constant dense<0.000000e+00> : vector<4x288xf32>
    %26 = tpu.matmul %24, %25, %cst_24 {dimension_numbers = #tpu.dot_dimension_numbers<[1], [0], [0], [1], [0, 0, 1, 1], [], []>} : vector<4x2xbf16>, vector<2x288xbf16>, vector<4x288xf32> -> vector<4x288xf32>
    %27 = arith.addf %22, %26 : vector<4x288xf32>
    %c1_25 = arith.constant 1 : index
    %c2_26 = arith.constant 2 : index
    %c0_27 = arith.constant 0 : index
    %c0_28 = arith.constant 0 : index
    %28 = vector.load %arg3[%c1_25, %c2_26, %c0_27, %c0_28] : memref<3x3x4x2xbf16, #tpu.memory_space<vmem>>, vector<1x1x4x2xbf16>
    %29 = vector.shape_cast %28 : vector<1x1x4x2xbf16> to vector<4x2xbf16>
    %30 = vector.extract_strided_slice %2 {offsets = [0, 20], sizes = [2, 288], strides = [1, 1]} : vector<2x342xbf16> to vector<2x288xbf16>
    %cst_29 = arith.constant dense<0.000000e+00> : vector<4x288xf32>
    %31 = tpu.matmul %29, %30, %cst_29 {dimension_numbers = #tpu.dot_dimension_numbers<[1], [0], [0], [1], [0, 0, 1, 1], [], []>} : vector<4x2xbf16>, vector<2x288xbf16>, vector<4x288xf32> -> vector<4x288xf32>
    %32 = arith.addf %27, %31 : vector<4x288xf32>
    %c2_30 = arith.constant 2 : index
    %c0_31 = arith.constant 0 : index
    %c0_32 = arith.constant 0 : index
    %c0_33 = arith.constant 0 : index
    %33 = vector.load %arg3[%c2_30, %c0_31, %c0_32, %c0_33] : memref<3x3x4x2xbf16, #tpu.memory_space<vmem>>, vector<1x1x4x2xbf16>
    %34 = vector.shape_cast %33 : vector<1x1x4x2xbf16> to vector<4x2xbf16>
    %35 = vector.extract_strided_slice %2 {offsets = [0, 36], sizes = [2, 288], strides = [1, 1]} : vector<2x342xbf16> to vector<2x288xbf16>
    %cst_34 = arith.constant dense<0.000000e+00> : vector<4x288xf32>
    %36 = tpu.matmul %34, %35, %cst_34 {dimension_numbers = #tpu.dot_dimension_numbers<[1], [0], [0], [1], [0, 0, 1, 1], [], []>} : vector<4x2xbf16>, vector<2x288xbf16>, vector<4x288xf32> -> vector<4x288xf32>
    %37 = arith.addf %32, %36 : vector<4x288xf32>
    %c2_35 = arith.constant 2 : index
    %c1_36 = arith.constant 1 : index
    %c0_37 = arith.constant 0 : index
    %c0_38 = arith.constant 0 : index
    %38 = vector.load %arg3[%c2_35, %c1_36, %c0_37, %c0_38] : memref<3x3x4x2xbf16, #tpu.memory_space<vmem>>, vector<1x1x4x2xbf16>
    %39 = vector.shape_cast %38 : vector<1x1x4x2xbf16> to vector<4x2xbf16>
    %40 = vector.extract_strided_slice %2 {offsets = [0, 37], sizes = [2, 288], strides = [1, 1]} : vector<2x342xbf16> to vector<2x288xbf16>
    %cst_39 = arith.constant dense<0.000000e+00> : vector<4x288xf32>
    %41 = tpu.matmul %39, %40, %cst_39 {dimension_numbers = #tpu.dot_dimension_numbers<[1], [0], [0], [1], [0, 0, 1, 1], [], []>} : vector<4x2xbf16>, vector<2x288xbf16>, vector<4x288xf32> -> vector<4x288xf32>
    %42 = arith.addf %37, %41 : vector<4x288xf32>
    %c2_40 = arith.constant 2 : index
    %c2_41 = arith.constant 2 : index
    %c0_42 = arith.constant 0 : index
    %c0_43 = arith.constant 0 : index
    %43 = vector.load %arg3[%c2_40, %c2_41, %c0_42, %c0_43] : memref<3x3x4x2xbf16, #tpu.memory_space<vmem>>, vector<1x1x4x2xbf16>
    %44 = vector.shape_cast %43 : vector<1x1x4x2xbf16> to vector<4x2xbf16>
    %45 = vector.extract_strided_slice %2 {offsets = [0, 38], sizes = [2, 288], strides = [1, 1]} : vector<2x342xbf16> to vector<2x288xbf16>
    %cst_44 = arith.constant dense<0.000000e+00> : vector<4x288xf32>
    %46 = tpu.matmul %44, %45, %cst_44 {dimension_numbers = #tpu.dot_dimension_numbers<[1], [0], [0], [1], [0, 0, 1, 1], [], []>} : vector<4x2xbf16>, vector<2x288xbf16>, vector<4x288xf32> -> vector<4x288xf32>
    %47 = arith.addf %42, %46 : vector<4x288xf32>
    %c0_45 = arith.constant 0 : index
    %c0_46 = arith.constant 0 : index
    %c0_47 = arith.constant 0 : index
    %48 = vector.load %arg2[%c0_45, %c0_46, %c0_47] : memref<1x2x342xbf16, #tpu.memory_space<vmem>>, vector<1x2x342xbf16>
    %49 = vector.shape_cast %48 : vector<1x2x342xbf16> to vector<2x342xbf16>
    %c0_48 = arith.constant 0 : index
    %c0_49 = arith.constant 0 : index
    %c0_50 = arith.constant 0 : index
    %c0_51 = arith.constant 0 : index
    %50 = vector.load %arg4[%c0_48, %c0_49, %c0_50, %c0_51] : memref<3x3x4x2xbf16, #tpu.memory_space<vmem>>, vector<1x1x4x2xbf16>
    %51 = vector.shape_cast %50 : vector<1x1x4x2xbf16> to vector<4x2xbf16>
    %52 = vector.extract_strided_slice %49 {offsets = [0, 0], sizes = [2, 288], strides = [1, 1]} : vector<2x342xbf16> to vector<2x288xbf16>
    %cst_52 = arith.constant dense<0.000000e+00> : vector<4x288xf32>
    %53 = tpu.matmul %51, %52, %cst_52 {dimension_numbers = #tpu.dot_dimension_numbers<[1], [0], [0], [1], [0, 0, 1, 1], [], []>} : vector<4x2xbf16>, vector<2x288xbf16>, vector<4x288xf32> -> vector<4x288xf32>
    %54 = arith.addf %47, %53 : vector<4x288xf32>
    %c0_53 = arith.constant 0 : index
    %c1_54 = arith.constant 1 : index
    %c0_55 = arith.constant 0 : index
    %c0_56 = arith.constant 0 : index
    %55 = vector.load %arg4[%c0_53, %c1_54, %c0_55, %c0_56] : memref<3x3x4x2xbf16, #tpu.memory_space<vmem>>, vector<1x1x4x2xbf16>
    %56 = vector.shape_cast %55 : vector<1x1x4x2xbf16> to vector<4x2xbf16>
    %57 = vector.extract_strided_slice %49 {offsets = [0, 1], sizes = [2, 288], strides = [1, 1]} : vector<2x342xbf16> to vector<2x288xbf16>
    %cst_57 = arith.constant dense<0.000000e+00> : vector<4x288xf32>
    %58 = tpu.matmul %56, %57, %cst_57 {dimension_numbers = #tpu.dot_dimension_numbers<[1], [0], [0], [1], [0, 0, 1, 1], [], []>} : vector<4x2xbf16>, vector<2x288xbf16>, vector<4x288xf32> -> vector<4x288xf32>
    %59 = arith.addf %54, %58 : vector<4x288xf32>
    %c0_58 = arith.constant 0 : index
    %c2_59 = arith.constant 2 : index
    %c0_60 = arith.constant 0 : index
    %c0_61 = arith.constant 0 : index
    %60 = vector.load %arg4[%c0_58, %c2_59, %c0_60, %c0_61] : memref<3x3x4x2xbf16, #tpu.memory_space<vmem>>, vector<1x1x4x2xbf16>
    %61 = vector.shape_cast %60 : vector<1x1x4x2xbf16> to vector<4x2xbf16>
    %62 = vector.extract_strided_slice %49 {offsets = [0, 2], sizes = [2, 288], strides = [1, 1]} : vector<2x342xbf16> to vector<2x288xbf16>
    %cst_62 = arith.constant dense<0.000000e+00> : vector<4x288xf32>
    %63 = tpu.matmul %61, %62, %cst_62 {dimension_numbers = #tpu.dot_dimension_numbers<[1], [0], [0], [1], [0, 0, 1, 1], [], []>} : vector<4x2xbf16>, vector<2x288xbf16>, vector<4x288xf32> -> vector<4x288xf32>
    %64 = arith.addf %59, %63 : vector<4x288xf32>
    %c1_63 = arith.constant 1 : index
    %c0_64 = arith.constant 0 : index
    %c0_65 = arith.constant 0 : index
    %c0_66 = arith.constant 0 : index
    %65 = vector.load %arg4[%c1_63, %c0_64, %c0_65, %c0_66] : memref<3x3x4x2xbf16, #tpu.memory_space<vmem>>, vector<1x1x4x2xbf16>
    %66 = vector.shape_cast %65 : vector<1x1x4x2xbf16> to vector<4x2xbf16>
    %67 = vector.extract_strided_slice %49 {offsets = [0, 18], sizes = [2, 288], strides = [1, 1]} : vector<2x342xbf16> to vector<2x288xbf16>
    %cst_67 = arith.constant dense<0.000000e+00> : vector<4x288xf32>
    %68 = tpu.matmul %66, %67, %cst_67 {dimension_numbers = #tpu.dot_dimension_numbers<[1], [0], [0], [1], [0, 0, 1, 1], [], []>} : vector<4x2xbf16>, vector<2x288xbf16>, vector<4x288xf32> -> vector<4x288xf32>
    %69 = arith.addf %64, %68 : vector<4x288xf32>
    %c1_68 = arith.constant 1 : index
    %c1_69 = arith.constant 1 : index
    %c0_70 = arith.constant 0 : index
    %c0_71 = arith.constant 0 : index
    %70 = vector.load %arg4[%c1_68, %c1_69, %c0_70, %c0_71] : memref<3x3x4x2xbf16, #tpu.memory_space<vmem>>, vector<1x1x4x2xbf16>
    %71 = vector.shape_cast %70 : vector<1x1x4x2xbf16> to vector<4x2xbf16>
    %72 = vector.extract_strided_slice %49 {offsets = [0, 19], sizes = [2, 288], strides = [1, 1]} : vector<2x342xbf16> to vector<2x288xbf16>
    %cst_72 = arith.constant dense<0.000000e+00> : vector<4x288xf32>
    %73 = tpu.matmul %71, %72, %cst_72 {dimension_numbers = #tpu.dot_dimension_numbers<[1], [0], [0], [1], [0, 0, 1, 1], [], []>} : vector<4x2xbf16>, vector<2x288xbf16>, vector<4x288xf32> -> vector<4x288xf32>
    %74 = arith.addf %69, %73 : vector<4x288xf32>
    %c1_73 = arith.constant 1 : index
    %c2_74 = arith.constant 2 : index
    %c0_75 = arith.constant 0 : index
    %c0_76 = arith.constant 0 : index
    %75 = vector.load %arg4[%c1_73, %c2_74, %c0_75, %c0_76] : memref<3x3x4x2xbf16, #tpu.memory_space<vmem>>, vector<1x1x4x2xbf16>
    %76 = vector.shape_cast %75 : vector<1x1x4x2xbf16> to vector<4x2xbf16>
    %77 = vector.extract_strided_slice %49 {offsets = [0, 20], sizes = [2, 288], strides = [1, 1]} : vector<2x342xbf16> to vector<2x288xbf16>
    %cst_77 = arith.constant dense<0.000000e+00> : vector<4x288xf32>
    %78 = tpu.matmul %76, %77, %cst_77 {dimension_numbers = #tpu.dot_dimension_numbers<[1], [0], [0], [1], [0, 0, 1, 1], [], []>} : vector<4x2xbf16>, vector<2x288xbf16>, vector<4x288xf32> -> vector<4x288xf32>
    %79 = arith.addf %74, %78 : vector<4x288xf32>
    %c2_78 = arith.constant 2 : index
    %c0_79 = arith.constant 0 : index
    %c0_80 = arith.constant 0 : index
    %c0_81 = arith.constant 0 : index
    %80 = vector.load %arg4[%c2_78, %c0_79, %c0_80, %c0_81] : memref<3x3x4x2xbf16, #tpu.memory_space<vmem>>, vector<1x1x4x2xbf16>
    %81 = vector.shape_cast %80 : vector<1x1x4x2xbf16> to vector<4x2xbf16>
    %82 = vector.extract_strided_slice %49 {offsets = [0, 36], sizes = [2, 288], strides = [1, 1]} : vector<2x342xbf16> to vector<2x288xbf16>
    %cst_82 = arith.constant dense<0.000000e+00> : vector<4x288xf32>
    %83 = tpu.matmul %81, %82, %cst_82 {dimension_numbers = #tpu.dot_dimension_numbers<[1], [0], [0], [1], [0, 0, 1, 1], [], []>} : vector<4x2xbf16>, vector<2x288xbf16>, vector<4x288xf32> -> vector<4x288xf32>
    %84 = arith.addf %79, %83 : vector<4x288xf32>
    %c2_83 = arith.constant 2 : index
    %c1_84 = arith.constant 1 : index
    %c0_85 = arith.constant 0 : index
    %c0_86 = arith.constant 0 : index
    %85 = vector.load %arg4[%c2_83, %c1_84, %c0_85, %c0_86] : memref<3x3x4x2xbf16, #tpu.memory_space<vmem>>, vector<1x1x4x2xbf16>
    %86 = vector.shape_cast %85 : vector<1x1x4x2xbf16> to vector<4x2xbf16>
    %87 = vector.extract_strided_slice %49 {offsets = [0, 37], sizes = [2, 288], strides = [1, 1]} : vector<2x342xbf16> to vector<2x288xbf16>
    %cst_87 = arith.constant dense<0.000000e+00> : vector<4x288xf32>
    %88 = tpu.matmul %86, %87, %cst_87 {dimension_numbers = #tpu.dot_dimension_numbers<[1], [0], [0], [1], [0, 0, 1, 1], [], []>} : vector<4x2xbf16>, vector<2x288xbf16>, vector<4x288xf32> -> vector<4x288xf32>
    %89 = arith.addf %84, %88 : vector<4x288xf32>
    %c2_88 = arith.constant 2 : index
    %c2_89 = arith.constant 2 : index
    %c0_90 = arith.constant 0 : index
    %c0_91 = arith.constant 0 : index
    %90 = vector.load %arg4[%c2_88, %c2_89, %c0_90, %c0_91] : memref<3x3x4x2xbf16, #tpu.memory_space<vmem>>, vector<1x1x4x2xbf16>
    %91 = vector.shape_cast %90 : vector<1x1x4x2xbf16> to vector<4x2xbf16>
    %92 = vector.extract_strided_slice %49 {offsets = [0, 38], sizes = [2, 288], strides = [1, 1]} : vector<2x342xbf16> to vector<2x288xbf16>
    %cst_92 = arith.constant dense<0.000000e+00> : vector<4x288xf32>
    %93 = tpu.matmul %91, %92, %cst_92 {dimension_numbers = #tpu.dot_dimension_numbers<[1], [0], [0], [1], [0, 0, 1, 1], [], []>} : vector<4x2xbf16>, vector<2x288xbf16>, vector<4x288xf32> -> vector<4x288xf32>
    %94 = arith.addf %89, %93 : vector<4x288xf32>
    %c0_93 = arith.constant 0 : index
    %c0_94 = arith.constant 0 : index
    %95 = vector.load %arg5[%c0_93, %c0_94] : memref<4x1xf32, #tpu.memory_space<vmem>>, vector<4x1xf32>
    %96 = vector.broadcast %95 : vector<4x1xf32> to vector<4x288xf32>
    %97 = arith.addf %94, %96 : vector<4x288xf32>
    %cst_95 = arith.constant 0.000000e+00 : f32
    %98 = vector.broadcast %cst_95 : f32 to vector<4x288xf32>
    %99 = arith.maximumf %97, %98 : vector<4x288xf32>
    %100 = arith.truncf %99 : vector<4x288xf32> to vector<4x288xbf16>
    %c0_96 = arith.constant 0 : index
    %c0_97 = arith.constant 0 : index
    %c0_98 = arith.constant 0 : index
    %101 = vector.load %arg6[%c0_96, %c0_97, %c0_98] : memref<1x4x288xbf16, #tpu.memory_space<vmem>>, vector<1x4x288xbf16>
    %102 = vector.shape_cast %101 : vector<1x4x288xbf16> to vector<4x288xbf16>
    %103 = vector.shape_cast %100 : vector<4x288xbf16> to vector<1x4x288xbf16>
    tpu.vector_store %arg6[%c0_96, %c0_97, %c0_98], %103 {strides = array<i32>} : memref<1x4x288xbf16, #tpu.memory_space<vmem>>, vector<1x4x288xbf16>,
    return
  }
  func.func @transform_0(%arg0: i32) -> (i32, i32, i32) {
    %c0_i32 = arith.constant 0 : i32
    %c0_i32_0 = arith.constant 0 : i32
    %c0_i32_1 = arith.constant 0 : i32
    return %arg0, %c0_i32, %c0_i32_0 : i32, i32, i32
  }
  func.func @transform_1(%arg0: i32) -> (i32, i32, i32) {
    %c0_i32 = arith.constant 0 : i32
    %c0_i32_0 = arith.constant 0 : i32
    %c0_i32_1 = arith.constant 0 : i32
    return %arg0, %c0_i32, %c0_i32_0 : i32, i32, i32
  }
  func.func @transform_2(%arg0: i32) -> (i32, i32, i32, i32) {
    %c0_i32 = arith.constant 0 : i32
    %c0_i32_0 = arith.constant 0 : i32
    %c0_i32_1 = arith.constant 0 : i32
    %c0_i32_2 = arith.constant 0 : i32
    %c0_i32_3 = arith.constant 0 : i32
    return %c0_i32, %c0_i32_0, %c0_i32_1, %c0_i32_2 : i32, i32, i32, i32
  }
  func.func @transform_3(%arg0: i32) -> (i32, i32, i32, i32) {
    %c0_i32 = arith.constant 0 : i32
    %c0_i32_0 = arith.constant 0 : i32
    %c0_i32_1 = arith.constant 0 : i32
    %c0_i32_2 = arith.constant 0 : i32
    %c0_i32_3 = arith.constant 0 : i32
    return %c0_i32, %c0_i32_0, %c0_i32_1, %c0_i32_2 : i32, i32, i32, i32
  }
  func.func @transform_4(%arg0: i32) -> (i32, i32) {
    %c0_i32 = arith.constant 0 : i32
    %c0_i32_0 = arith.constant 0 : i32
    %c0_i32_1 = arith.constant 0 : i32
    return %c0_i32, %c0_i32_0 : i32, i32
  }
  func.func @transform_5(%arg0: i32) -> (i32, i32, i32) {
    %c0_i32 = arith.constant 0 : i32
    %c0_i32_0 = arith.constant 0 : i32
    %c0_i32_1 = arith.constant 0 : i32
    return %arg0, %c0_i32, %c0_i32_0 : i32, i32, i32
  }
}

module attributes {stable_mosaic.version = 11 : i64} {
  func.func @kernel(%arg0: i32, %arg1: memref<1x4x342xbf16, #tpu.memory_space<vmem>>, %arg2: memref<3x3x4x4xbf16, #tpu.memory_space<vmem>>, %arg3: memref<4x1xf32, #tpu.memory_space<vmem>>, %arg4: memref<1x4x288xf32, #tpu.memory_space<vmem>>) attributes {dimension_semantics = [#tpu.dimension_semantics<parallel>], iteration_bounds = array<i64: 2>, scalar_prefetch = 0 : i64, scratch_operands = 0 : i64, tpu.core_type = #tpu.core_type<tc>, window_params = [{transform_indices = @transform_0, window_bounds = array<i64: 1, 4, 342>}, {pipeline_mode = #tpu.pipeline_mode<synchronous>, transform_indices = @transform_1, window_bounds = array<i64: 3, 3, 4, 4>}, {pipeline_mode = #tpu.pipeline_mode<synchronous>, transform_indices = @transform_2, window_bounds = array<i64: 4, 1>}, {transform_indices = @transform_3, window_bounds = array<i64: 1, 4, 288>}]} {
    %cst = arith.constant 0.000000e+00 : f32
    %0 = vector.broadcast %cst : f32 to vector<4x288xf32>
    %c0 = arith.constant 0 : index
    %c0_0 = arith.constant 0 : index
    %c0_1 = arith.constant 0 : index
    %1 = vector.load %arg1[%c0, %c0_0, %c0_1] : memref<1x4x342xbf16, #tpu.memory_space<vmem>>, vector<1x4x342xbf16>
    %2 = vector.shape_cast %1 : vector<1x4x342xbf16> to vector<4x342xbf16>
    %c0_2 = arith.constant 0 : index
    %c0_3 = arith.constant 0 : index
    %c0_4 = arith.constant 0 : index
    %c0_5 = arith.constant 0 : index
    %3 = vector.load %arg2[%c0_2, %c0_3, %c0_4, %c0_5] : memref<3x3x4x4xbf16, #tpu.memory_space<vmem>>, vector<1x1x4x4xbf16>
    %4 = vector.shape_cast %3 : vector<1x1x4x4xbf16> to vector<4x4xbf16>
    %5 = vector.extract_strided_slice %2 {offsets = [0, 0], sizes = [4, 288], strides = [1, 1]} : vector<4x342xbf16> to vector<4x288xbf16>
    %cst_6 = arith.constant dense<0.000000e+00> : vector<4x288xf32>
    %6 = tpu.matmul %4, %5, %cst_6 {dimension_numbers = #tpu.dot_dimension_numbers<[1], [0], [0], [1], [0, 0, 1, 1], [], []>} : vector<4x4xbf16>, vector<4x288xbf16>, vector<4x288xf32> -> vector<4x288xf32>
    %7 = arith.addf %0, %6 : vector<4x288xf32>
    %c0_7 = arith.constant 0 : index
    %c1 = arith.constant 1 : index
    %c0_8 = arith.constant 0 : index
    %c0_9 = arith.constant 0 : index
    %8 = vector.load %arg2[%c0_7, %c1, %c0_8, %c0_9] : memref<3x3x4x4xbf16, #tpu.memory_space<vmem>>, vector<1x1x4x4xbf16>
    %9 = vector.shape_cast %8 : vector<1x1x4x4xbf16> to vector<4x4xbf16>
    %10 = vector.extract_strided_slice %2 {offsets = [0, 1], sizes = [4, 288], strides = [1, 1]} : vector<4x342xbf16> to vector<4x288xbf16>
    %cst_10 = arith.constant dense<0.000000e+00> : vector<4x288xf32>
    %11 = tpu.matmul %9, %10, %cst_10 {dimension_numbers = #tpu.dot_dimension_numbers<[1], [0], [0], [1], [0, 0, 1, 1], [], []>} : vector<4x4xbf16>, vector<4x288xbf16>, vector<4x288xf32> -> vector<4x288xf32>
    %12 = arith.addf %7, %11 : vector<4x288xf32>
    %c0_11 = arith.constant 0 : index
    %c2 = arith.constant 2 : index
    %c0_12 = arith.constant 0 : index
    %c0_13 = arith.constant 0 : index
    %13 = vector.load %arg2[%c0_11, %c2, %c0_12, %c0_13] : memref<3x3x4x4xbf16, #tpu.memory_space<vmem>>, vector<1x1x4x4xbf16>
    %14 = vector.shape_cast %13 : vector<1x1x4x4xbf16> to vector<4x4xbf16>
    %15 = vector.extract_strided_slice %2 {offsets = [0, 2], sizes = [4, 288], strides = [1, 1]} : vector<4x342xbf16> to vector<4x288xbf16>
    %cst_14 = arith.constant dense<0.000000e+00> : vector<4x288xf32>
    %16 = tpu.matmul %14, %15, %cst_14 {dimension_numbers = #tpu.dot_dimension_numbers<[1], [0], [0], [1], [0, 0, 1, 1], [], []>} : vector<4x4xbf16>, vector<4x288xbf16>, vector<4x288xf32> -> vector<4x288xf32>
    %17 = arith.addf %12, %16 : vector<4x288xf32>
    %c1_15 = arith.constant 1 : index
    %c0_16 = arith.constant 0 : index
    %c0_17 = arith.constant 0 : index
    %c0_18 = arith.constant 0 : index
    %18 = vector.load %arg2[%c1_15, %c0_16, %c0_17, %c0_18] : memref<3x3x4x4xbf16, #tpu.memory_space<vmem>>, vector<1x1x4x4xbf16>
    %19 = vector.shape_cast %18 : vector<1x1x4x4xbf16> to vector<4x4xbf16>
    %20 = vector.extract_strided_slice %2 {offsets = [0, 18], sizes = [4, 288], strides = [1, 1]} : vector<4x342xbf16> to vector<4x288xbf16>
    %cst_19 = arith.constant dense<0.000000e+00> : vector<4x288xf32>
    %21 = tpu.matmul %19, %20, %cst_19 {dimension_numbers = #tpu.dot_dimension_numbers<[1], [0], [0], [1], [0, 0, 1, 1], [], []>} : vector<4x4xbf16>, vector<4x288xbf16>, vector<4x288xf32> -> vector<4x288xf32>
    %22 = arith.addf %17, %21 : vector<4x288xf32>
    %c1_20 = arith.constant 1 : index
    %c1_21 = arith.constant 1 : index
    %c0_22 = arith.constant 0 : index
    %c0_23 = arith.constant 0 : index
    %23 = vector.load %arg2[%c1_20, %c1_21, %c0_22, %c0_23] : memref<3x3x4x4xbf16, #tpu.memory_space<vmem>>, vector<1x1x4x4xbf16>
    %24 = vector.shape_cast %23 : vector<1x1x4x4xbf16> to vector<4x4xbf16>
    %25 = vector.extract_strided_slice %2 {offsets = [0, 19], sizes = [4, 288], strides = [1, 1]} : vector<4x342xbf16> to vector<4x288xbf16>
    %cst_24 = arith.constant dense<0.000000e+00> : vector<4x288xf32>
    %26 = tpu.matmul %24, %25, %cst_24 {dimension_numbers = #tpu.dot_dimension_numbers<[1], [0], [0], [1], [0, 0, 1, 1], [], []>} : vector<4x4xbf16>, vector<4x288xbf16>, vector<4x288xf32> -> vector<4x288xf32>
    %27 = arith.addf %22, %26 : vector<4x288xf32>
    %c1_25 = arith.constant 1 : index
    %c2_26 = arith.constant 2 : index
    %c0_27 = arith.constant 0 : index
    %c0_28 = arith.constant 0 : index
    %28 = vector.load %arg2[%c1_25, %c2_26, %c0_27, %c0_28] : memref<3x3x4x4xbf16, #tpu.memory_space<vmem>>, vector<1x1x4x4xbf16>
    %29 = vector.shape_cast %28 : vector<1x1x4x4xbf16> to vector<4x4xbf16>
    %30 = vector.extract_strided_slice %2 {offsets = [0, 20], sizes = [4, 288], strides = [1, 1]} : vector<4x342xbf16> to vector<4x288xbf16>
    %cst_29 = arith.constant dense<0.000000e+00> : vector<4x288xf32>
    %31 = tpu.matmul %29, %30, %cst_29 {dimension_numbers = #tpu.dot_dimension_numbers<[1], [0], [0], [1], [0, 0, 1, 1], [], []>} : vector<4x4xbf16>, vector<4x288xbf16>, vector<4x288xf32> -> vector<4x288xf32>
    %32 = arith.addf %27, %31 : vector<4x288xf32>
    %c2_30 = arith.constant 2 : index
    %c0_31 = arith.constant 0 : index
    %c0_32 = arith.constant 0 : index
    %c0_33 = arith.constant 0 : index
    %33 = vector.load %arg2[%c2_30, %c0_31, %c0_32, %c0_33] : memref<3x3x4x4xbf16, #tpu.memory_space<vmem>>, vector<1x1x4x4xbf16>
    %34 = vector.shape_cast %33 : vector<1x1x4x4xbf16> to vector<4x4xbf16>
    %35 = vector.extract_strided_slice %2 {offsets = [0, 36], sizes = [4, 288], strides = [1, 1]} : vector<4x342xbf16> to vector<4x288xbf16>
    %cst_34 = arith.constant dense<0.000000e+00> : vector<4x288xf32>
    %36 = tpu.matmul %34, %35, %cst_34 {dimension_numbers = #tpu.dot_dimension_numbers<[1], [0], [0], [1], [0, 0, 1, 1], [], []>} : vector<4x4xbf16>, vector<4x288xbf16>, vector<4x288xf32> -> vector<4x288xf32>
    %37 = arith.addf %32, %36 : vector<4x288xf32>
    %c2_35 = arith.constant 2 : index
    %c1_36 = arith.constant 1 : index
    %c0_37 = arith.constant 0 : index
    %c0_38 = arith.constant 0 : index
    %38 = vector.load %arg2[%c2_35, %c1_36, %c0_37, %c0_38] : memref<3x3x4x4xbf16, #tpu.memory_space<vmem>>, vector<1x1x4x4xbf16>
    %39 = vector.shape_cast %38 : vector<1x1x4x4xbf16> to vector<4x4xbf16>
    %40 = vector.extract_strided_slice %2 {offsets = [0, 37], sizes = [4, 288], strides = [1, 1]} : vector<4x342xbf16> to vector<4x288xbf16>
    %cst_39 = arith.constant dense<0.000000e+00> : vector<4x288xf32>
    %41 = tpu.matmul %39, %40, %cst_39 {dimension_numbers = #tpu.dot_dimension_numbers<[1], [0], [0], [1], [0, 0, 1, 1], [], []>} : vector<4x4xbf16>, vector<4x288xbf16>, vector<4x288xf32> -> vector<4x288xf32>
    %42 = arith.addf %37, %41 : vector<4x288xf32>
    %c2_40 = arith.constant 2 : index
    %c2_41 = arith.constant 2 : index
    %c0_42 = arith.constant 0 : index
    %c0_43 = arith.constant 0 : index
    %43 = vector.load %arg2[%c2_40, %c2_41, %c0_42, %c0_43] : memref<3x3x4x4xbf16, #tpu.memory_space<vmem>>, vector<1x1x4x4xbf16>
    %44 = vector.shape_cast %43 : vector<1x1x4x4xbf16> to vector<4x4xbf16>
    %45 = vector.extract_strided_slice %2 {offsets = [0, 38], sizes = [4, 288], strides = [1, 1]} : vector<4x342xbf16> to vector<4x288xbf16>
    %cst_44 = arith.constant dense<0.000000e+00> : vector<4x288xf32>
    %46 = tpu.matmul %44, %45, %cst_44 {dimension_numbers = #tpu.dot_dimension_numbers<[1], [0], [0], [1], [0, 0, 1, 1], [], []>} : vector<4x4xbf16>, vector<4x288xbf16>, vector<4x288xf32> -> vector<4x288xf32>
    %47 = arith.addf %42, %46 : vector<4x288xf32>
    %c0_45 = arith.constant 0 : index
    %c0_46 = arith.constant 0 : index
    %48 = vector.load %arg3[%c0_45, %c0_46] : memref<4x1xf32, #tpu.memory_space<vmem>>, vector<4x1xf32>
    %49 = vector.broadcast %48 : vector<4x1xf32> to vector<4x288xf32>
    %50 = arith.addf %47, %49 : vector<4x288xf32>
    %cst_47 = arith.constant 0.000000e+00 : f32
    %51 = vector.broadcast %cst_47 : f32 to vector<4x288xf32>
    %52 = arith.maximumf %50, %51 : vector<4x288xf32>
    %c0_48 = arith.constant 0 : index
    %c0_49 = arith.constant 0 : index
    %c0_50 = arith.constant 0 : index
    %53 = vector.load %arg4[%c0_48, %c0_49, %c0_50] : memref<1x4x288xf32, #tpu.memory_space<vmem>>, vector<1x4x288xf32>
    %54 = vector.shape_cast %53 : vector<1x4x288xf32> to vector<4x288xf32>
    %55 = vector.shape_cast %52 : vector<4x288xf32> to vector<1x4x288xf32>
    tpu.vector_store %arg4[%c0_48, %c0_49, %c0_50], %55 {strides = array<i32>} : memref<1x4x288xf32, #tpu.memory_space<vmem>>, vector<1x4x288xf32>,
    return
  }
  func.func @transform_0(%arg0: i32) -> (i32, i32, i32) {
    %c0_i32 = arith.constant 0 : i32
    %c0_i32_0 = arith.constant 0 : i32
    %c0_i32_1 = arith.constant 0 : i32
    return %arg0, %c0_i32, %c0_i32_0 : i32, i32, i32
  }
  func.func @transform_1(%arg0: i32) -> (i32, i32, i32, i32) {
    %c0_i32 = arith.constant 0 : i32
    %c0_i32_0 = arith.constant 0 : i32
    %c0_i32_1 = arith.constant 0 : i32
    %c0_i32_2 = arith.constant 0 : i32
    %c0_i32_3 = arith.constant 0 : i32
    return %c0_i32, %c0_i32_0, %c0_i32_1, %c0_i32_2 : i32, i32, i32, i32
  }
  func.func @transform_2(%arg0: i32) -> (i32, i32) {
    %c0_i32 = arith.constant 0 : i32
    %c0_i32_0 = arith.constant 0 : i32
    %c0_i32_1 = arith.constant 0 : i32
    return %c0_i32, %c0_i32_0 : i32, i32
  }
  func.func @transform_3(%arg0: i32) -> (i32, i32, i32) {
    %c0_i32 = arith.constant 0 : i32
    %c0_i32_0 = arith.constant 0 : i32
    %c0_i32_1 = arith.constant 0 : i32
    return %arg0, %c0_i32, %c0_i32_0 : i32, i32, i32
  }
}

</mosaic_0001>

<bundles_post_ra>
// kernel: tile.8
= control target key start
LH: loop header
LB: loop body
LE: loop exit
PB: predicated region body
PF: predicated region fallthrough
CT: control target
= control target key end

     0   :  { %s22_s0 = inlined_call_operand.vmem [shape: f32[2], index: 0, kind: input, shape index: {}]   ;;  %s23_s1 = inlined_call_operand.vmem [shape: f32[4,2], index: 1, kind: output, shape index: {}]  }
   0x1   :  { %v4_v0 = vld [vmem:[%s22_s0] ss:$0 sm:$0xff] }
   0x2   :  { %5 = vst [vmem:[%s23_s1] sm:$0xf] %v4_v0 }

// kernel: tile.0
= control target key start
LH: loop header
LB: loop body
LE: loop exit
PB: predicated region body
PF: predicated region fallthrough
CT: control target
= control target key end

     0   :  { %vm8_vm0 = vcmask 7168   ;;  %s38_s0 = inlined_call_operand.vmem [shape: f32[4,2], index: 0, kind: input, shape index: {}]   ;;  %s39_s1 = inlined_call_operand.vmem [shape: f32[8,1], index: 1, kind: output, shape index: {}]  }
   0x1   :  { %v5_v0 = vld [vmem:[%s38_s0] sm:$0xf]  ;;  %s18_s0 = smov 127  }
   0x2   :  { %6 = vst [vmem:[#allocation0] sm:$0xf] %v5_v0 }
   0x9   :  { %v10_v1 = vld [vmem:[#allocation0] sm:$0xf]  }
   0xa   :  { %v7_v2 = vld [vmem:[#allocation0] sm:$0xf]   ;;  %11 = vrot.lane.b32.xlu0 %v10_v1, %s18_s0 }
   0xb   :  { %9 = vst.msk [vmem:[%s39_s1] ss:$2 sm:$0xf] %vm8_vm0, %v7_v2  }
  0x7c   :  { %v12_v3 = vpop.permute.xlu0 %11  }
  0x7d   :  { %16 = vst.msk [vmem:[%s39_s1 + $0x1] ss:$2 sm:$0xf] %vm8_vm0, %v12_v3  }

// kernel: up_forward.3
= control target key start
LH: loop header
LB: loop body
LE: loop exit
PB: predicated region body
PF: predicated region fallthrough
CT: control target
= control target key end

     0   :  { %s340_s12 = smov 0   ;;  %s363_s0 = inlined_call_operand.vmem [shape: bf16[2,4,64], index: 0, kind: input, shape index: {}]   ;;  %s364_s1 = inlined_call_operand.vmem [shape: bf16[8,4], index: 1, kind: input, shape index: {}]   ;;  %s365_s2 = inlined_call_operand.vmem [shape: f32[8,1], index: 2, kind: input, shape index: {}]   ;;  %s366_s3 = inlined_call_operand.vmem [shape: bf16[2,8,64], index: 3, kind: output, shape index: {}]  }
   0x1 LB: > { %s279_s13 = sadd.s32 4294967295, %s315_s12   ;;  %p283_p0 = scmp.ge.s32.totalorder %s315_s12, 1  ;;  %s315_s12 = sphi %s340_s12, %s13_s12  }
   0x2   : > { %p136_p1 = scmp.lt.s32.totalorder %s315_s12, 3 }
   0x4   : > { %p137_p2 = pnand %p283_p0, %p136_p1 }
   0x5   : > { %p158_p3 = scmp.lt.s32.totalorder (!%p137_p2), %s279_s13, 1 }
   0x6   : > { %140 = sbr.rel (%p137_p2) target bundleno = 218 (0xda), region = 32 }
   0xb   : > { %v317_v0 = vmov 0.0   ;;  %vm318_vm0 = vmmov 0   ;;  %v169_v1 = vld [vmem:[%s365_s2] sm:$0xff]  ;;  %s368_s13 = smov (!%p158_p3, %s279_s13), 1  ;;  %v319_v2 = vmov 0   ;;  %vm179_vm1 = vcmask 1041408  }
   0xc   : > { %291 = vmatprep.subr.bf16.mxu0 %v317_v0  ;;  %293 = vmatprep.mubr.msk.bf16.mxu0 %vm318_vm0, %v317_v0  ;;  %s284_s16 = sshll.u32 %s368_s13, 1  ;;  %v167_v5 = vld [vmem:[%s364_s1] sm:$0xf]  ;;  %vm175_vm2 = vcmask 31744   ;;  %s285_s22 = sshll.u32 %s368_s13, 2  ;;  %vm224_vm3 = vcmask 519168  }
   0xd   : > { %308 = vset.pattern.permute.xlu0 %v319_v2  ;;  %s161_s19 = scalar_lea.vmem %s363_s0, %s284_s16  ;;  %s165_s25 = scalar_lea.vmem %s366_s3, %s285_s22 }
   0xe   : > { %172 = vperm.xlu0 %308, %v169_v1   ;;  %v168_v3 = vld [vmem:[%s161_s19] sm:$0x3] }
   0xf   : > { %v181_v4 = vsel %vm179_vm1, %v168_v3, 0 }
  0x10   : > { %292 = vmatpush3.bf16.msra.mxu0 %v181_v4 }
  0x13   : > { %294 = vmatmul.mubr.msk.bf16.vlgmr.msra.gmra.mxu0 %vm175_vm2, %v167_v5 }
  0x89   : > { %v173_v6 = vpop.permute.xlu0 %172 }
  0xd3   : > { %v217_v7 = vpop.f32.mrf.mxu0 }
  0xd4   : > { %v218_v8 = vadd.f32 %v217_v7, %v173_v6 }
  0xd5   : > { %v295_v9 = vpop.f32.mrf.mxu0 }
  0xd6   : > { %v223_v10 = vpack.c.bf16 %v218_v8, %v218_v8 }
  0xd7   : > { %v220_v11 = vpop.f32.mrf.mxu0 }
  0xd8   : > { %225 = vst.msk [vmem:[%s165_s25] sm:$0xf] %vm224_vm3, %v223_v10 }
  0xd9   : > { %v296_v12 = vpop.f32.mrf.mxu0 }
  0xda PF: > { %s13_s12 = sadd.s32 1, %s315_s12  }
  0xdb   : > { %p10_p4 = scmp.ge.s32.totalorder %s13_s12, 4  }
  0xdd   :  { %12 = sbr.rel (!%p10_p4) target bundleno = 1 (0x1), region = 62 }

// kernel: up_forward.5
= control target key start
LH: loop header
LB: loop body
LE: loop exit
PB: predicated region body
PF: predicated region fallthrough
CT: control target
= control target key end

     0   :  { %s1393_s12 = smov 0   ;;  %s1528_s0 = inlined_call_operand.vmem [shape: bf16[2,4,342], index: 0, kind: input, shape index: {}]   ;;  %s1529_s1 = inlined_call_operand.vmem [shape: bf16[3,3,4,4], index: 1, kind: input, shape index: {}]   ;;  %s1530_s2 = inlined_call_operand.vmem [shape: f32[4,1], index: 2, kind: input, shape index: {}]   ;;  %s1531_s3 = inlined_call_operand.vmem [shape: f32[2,4,288], index: 3, kind: output, shape index: {}]  }
   0x1 LB: > { %s1213_s13 = sadd.s32 4294967295, %s1359_s12   ;;  %p1217_p0 = scmp.ge.s32.totalorder %s1359_s12, 1  ;;  %s1359_s12 = sphi %s1393_s12, %s13_s12  }
   0x2   : > { %p137_p1 = scmp.lt.s32.totalorder %s1359_s12, 3 }
   0x4   : > { %p138_p2 = pnand %p1217_p0, %p137_p1 }
   0x5   : > { %p161_p3 = scmp.lt.s32.totalorder (!%p138_p2), %s1213_s13, 1  ;;  %s1365_s18 = smov (!%p138_p2), 127  }
   0x6   : > { %141 = sbr.rel (%p138_p2) target bundleno = 412 (0x19c), region = 32  ;;  %s1366_s19 = smov (!%p138_p2), 126  }
   0x7   : > { %s1367_s20 = smov (!%p138_p2), 110   ;;  %s1368_s21 = smov (!%p138_p2), 109  }
   0x8   : > { %s1369_s22 = smov (!%p138_p2), 108   ;;  %s1370_s23 = smov (!%p138_p2), 92  }
   0x9   : > { %s1371_s24 = smov (!%p138_p2), 91   ;;  %s1372_s25 = smov (!%p138_p2), 90  }
   0xb   : > { %v181_v0 = vlaneseq  ;;  %v1361_v1 = vmov 1983009808   ;;  %v1362_v3 = vmov 0.0   ;;  %s1533_s13 = smov (!%p161_p3, %s1213_s13), 1  ;;  %vm1363_vm0 = vmmov 0  }
   0xc   : > { %v179_v2 = vunpack.c.l.s4 %v1361_v1  ;;  %1275 = vmatprep.subr.bf16.mxu1 %v1362_v3  ;;  %1277 = vmatprep.mubr.msk.bf16.mxu1 %vm1363_vm0, %v1362_v3  ;;  %s1329_s14 = smul.u32 6, %s1533_s13  ;;  %v1364_v6 = vmov 0   ;;  %v1139_v13 = vld [vmem:[%s1530_s2] sm:$0xf]  ;;  %vm206_vm1 = vcmask 1041408   ;;  %vm199_vm2 = vcmask 1039360  }
   0xd   : > { %v182_v4 = vshrl.u32 %v181_v0, 7  ;;  %248 = vmatprep.mubr.bf16.mxu0 %v1364_v6  ;;  %1351 = vset.pattern.permute.xlu0 %v1364_v6  ;;  %v1220_v18 = vld [vmem:[%s1529_s1 + $0x2] sm:$0x3]  ;;  %vm202_vm3 = vcmask 31744   ;;  %vm398_vm4 = vcmask 1031168   ;;  %vm505_vm5 = vcmask 900096  }
   0xe   : > { %v180_v5 = vunpack.c.0.s8 %v179_v2  ;;  %s165_s17 = scalar_lea.vmem %s1528_s0, %s1329_s14  ;;  %v173_v28 = vld [vmem:[%s1529_s1] sm:$0x3]  ;;  %v1227_v37 = vld [vmem:[%s1529_s1 + $0x4] sm:$0x3]  ;;  %vm612_vm6 = vcmask 891904   ;;  %vm719_vm7 = vcmask 883712  }
   0xf   : > { %v172_v8 = vld [vmem:[%s165_s17] sm:$0x3f]  ;;  %v1231_v46 = vld [vmem:[%s1529_s1 + $0x6] sm:$0x3]  ;;  %v1235_v54 = vld [vmem:[%s1529_s1 + $0x8] sm:$0x3] }
  0x10   : > { %v183_v7 = vsub.s32 %v180_v5, %v182_v4  ;;  %v177_v10 = vcombine.high %v172_v8, %v172_v8  ;;  %vm826_vm8 = vcmask 752640   ;;  %v1239_v62 = vld [vmem:[%s1529_s1 + $0xa] sm:$0x3]  ;;  %vm933_vm9 = vcmask 744448  }
  0x11   : > { %vm1040_vm10 = vcmask 736256   ;;  %vm1156_vm11 = vcmask 257024  }
  0x12   : > { %v184_v9 = vrot.slane %v172_v8, %v183_v7  ;;  %v191_v11 = vrot.slane %v177_v10, %v183_v7  ;;  %v1243_v7 = vld [vmem:[%s1529_s1 + $0xc] sm:$0x3] }
  0x14   : > { %193 = vrot.lane.b32.xlu0 %v184_v9, %s1365_s18  ;;  %v192_v12 = vcombine.high %v184_v9, %v184_v9  ;;  %197 = vrot.lane.b32.xlu1 %v191_v11, %s1365_s18  ;;  %v307_v21 = vsel %vm206_vm1, %v191_v11, 0  ;;  %v301_v24 = vsel %vm206_vm1, %v184_v9, 0 }
  0x18   : > { %195 = vrot.lane.b32.xlu0 %v192_v12, %s1365_s18  ;;  %392 = vrot.lane.b32.xlu1 %v184_v9, %s1366_s19 }
  0x1c   : > { %394 = vrot.lane.b32.xlu0 %v192_v12, %s1366_s19  ;;  %396 = vrot.lane.b32.xlu1 %v191_v11, %s1366_s19 }
  0x20   : > { %499 = vrot.lane.b32.xlu0 %v184_v9, %s1367_s20  ;;  %501 = vrot.lane.b32.xlu1 %v192_v12, %s1367_s20 }
  0x24   : > { %503 = vrot.lane.b32.xlu0 %v191_v11, %s1367_s20  ;;  %606 = vrot.lane.b32.xlu1 %v184_v9, %s1368_s21 }
  0x28   : > { %608 = vrot.lane.b32.xlu0 %v192_v12, %s1368_s21  ;;  %610 = vrot.lane.b32.xlu1 %v191_v11, %s1368_s21  ;;  %s1330_s21 = smul.u32 12, %s1533_s13 }
  0x2c   : > { %713 = vrot.lane.b32.xlu0 %v184_v9, %s1369_s22  ;;  %715 = vrot.lane.b32.xlu1 %v192_v12, %s1369_s22 }
  0x30   : > { %717 = vrot.lane.b32.xlu0 %v191_v11, %s1369_s22  ;;  %820 = vrot.lane.b32.xlu1 %v184_v9, %s1370_s23 }
  0x34   : > { %822 = vrot.lane.b32.xlu0 %v192_v12, %s1370_s23  ;;  %824 = vrot.lane.b32.xlu1 %v191_v11, %s1370_s23 }
  0x38   : > { %927 = vrot.lane.b32.xlu0 %v184_v9, %s1371_s24  ;;  %929 = vrot.lane.b32.xlu1 %v192_v12, %s1371_s24 }
  0x3c   : > { %931 = vrot.lane.b32.xlu0 %v191_v11, %s1371_s24  ;;  %1034 = vrot.lane.b32.xlu1 %v184_v9, %s1372_s25  ;;  %s170_s24 = scalar_lea.vmem %s1531_s3, %s1330_s21 }
  0x40   : > { %1036 = vrot.lane.b32.xlu0 %v192_v12, %s1372_s25  ;;  %1038 = vrot.lane.b32.xlu1 %v191_v11, %s1372_s25 }
  0x44   : > { %1142 = vperm.xlu0 %1351, %v1139_v13  }
  0x86   : > { %v194_v14 = vpop.permute.xlu0 %193  ;;  %v198_v15 = vpop.permute.xlu1 %197 }
  0x87   : > { %v214_v16 = vsel %vm206_vm1, %v198_v15, 0 }
  0x88   : > { %1276 = vmatpush3.bf16.msra.mxu1 %v214_v16 }
  0x89   : > { %1281 = vmatprep.subr.bf16.mxu1 %v1362_v3 }
  0x8a   : > { %v196_v17 = vpop.permute.xlu0 %195  ;;  %v393_v23 = vpop.permute.xlu1 %392 }
  0x8b   : > { %v201_v19 = vsel %vm199_vm2, %v196_v17, %v198_v15  ;;  %v200_v20 = vsel %vm199_vm2, %v194_v14, %v196_v17  ;;  %1278 = vmatmul.mubr.msk.bf16.vlgmr.msra.gmra.mxu1 %vm202_vm3, %v1220_v18  ;;  %v1247_v14 = vld [vmem:[%s1529_s1 + $0xe] sm:$0x3] }
  0x8c   : > { %1221 = vmatprep.subr.msk.bf16.mxu0 %vm206_vm1, %v201_v19  ;;  %v208_v22 = vsel %vm206_vm1, %v200_v20, 0  ;;  %1282 = vmatpush3.bf16.msra.mxu1 %v307_v21 }
  0x8d   : > { %231 = vmatpush1.bf16.msra.mxu0 %v208_v22  ;;  %1283 = vmatprep.mubr.msk.bf16.mxu1 %vm1363_vm0, %v1362_v3 }
  0x8e   : > { %1224 = vmatprep.subr.msk.bf16.mxu0 %vm206_vm1, %v192_v12  ;;  %v395_v25 = vpop.permute.xlu0 %394  ;;  %1287 = vmatprep.subr.bf16.mxu1 %v1362_v3  ;;  %v397_v26 = vpop.permute.xlu1 %396 }
  0x8f   : > { %v400_v27 = vsel %vm398_vm4, %v395_v25, %v397_v26  ;;  %v399_v30 = vsel %vm398_vm4, %v393_v23, %v395_v25  ;;  %v411_v31 = vsel %vm206_vm1, %v397_v26, 0 }
  0x90   : > { %1222 = vmatmul.mubr.msk.bf16.vlgmr.msra.gmra.mxu0 %vm202_vm3, %v1220_v18  ;;  %v405_v33 = vsel %vm206_vm1, %v399_v30, 0  ;;  %v1251_v18 = vld [vmem:[%s1529_s1 + $0x10] sm:$0x3] }
  0x91   : > { %324 = vmatpush1.bf16.msra.mxu0 %v301_v24  ;;  %341 = vmatprep.mubr.bf16.mxu0 %v1364_v6 }
  0x92   : > { %1228 = vmatprep.subr.msk.bf16.mxu0 %vm206_vm1, %v400_v27  ;;  %v500_v29 = vpop.permute.xlu0 %499  ;;  %v502_v32 = vpop.permute.xlu1 %501 }
  0x93   : > { %1284 = vmatmul.mubr.msk.bf16.vlgmr.msra.gmra.mxu1 %vm202_vm3, %v173_v28  ;;  %v506_v39 = vsel %vm505_vm5, %v500_v29, %v502_v32 }
  0x94   : > { %1288 = vmatpush3.bf16.msra.mxu1 %v411_v31  ;;  %1289 = vmatprep.mubr.msk.bf16.mxu1 %vm1363_vm0, %v1362_v3  ;;  %v512_v42 = vsel %vm206_vm1, %v506_v39, 0 }
  0x95   : > { %1293 = vmatprep.subr.bf16.mxu1 %v1362_v3 }
  0x96   : > { %v504_v34 = vpop.permute.xlu0 %503  ;;  %v607_v36 = vpop.permute.xlu1 %606 }
  0x97   : > { %v507_v35 = vsel %vm505_vm5, %v502_v32, %v504_v34  ;;  %v518_v40 = vsel %vm206_vm1, %v504_v34, 0 }
  0x98   : > { %1225 = vmatmul.mubr.msk.bf16.vlgmr.msra.gmra.mxu0 %vm202_vm3, %v173_v28 }
  0x99   : > { %428 = vmatpush1.bf16.msra.mxu0 %v405_v33  ;;  %445 = vmatprep.mubr.bf16.mxu0 %v1364_v6 }
  0x9a   : > { %1232 = vmatprep.subr.msk.bf16.mxu0 %vm206_vm1, %v507_v35  ;;  %v609_v38 = vpop.permute.xlu0 %608  ;;  %v611_v41 = vpop.permute.xlu1 %610 }
  0x9b   : > { %1290 = vmatmul.mubr.msk.bf16.vlgmr.msra.gmra.mxu1 %vm202_vm3, %v1227_v37  ;;  %v614_v44 = vsel %vm612_vm6, %v609_v38, %v611_v41  ;;  %v613_v47 = vsel %vm612_vm6, %v607_v36, %v609_v38  ;;  %v625_v48 = vsel %vm206_vm1, %v611_v41, 0 }
  0x9c   : > { %1294 = vmatpush3.bf16.msra.mxu1 %v518_v40  ;;  %1295 = vmatprep.mubr.msk.bf16.mxu1 %vm1363_vm0, %v1362_v3  ;;  %v619_v50 = vsel %vm206_vm1, %v613_v47, 0 }
  0x9d   : > { %1299 = vmatprep.subr.bf16.mxu1 %v1362_v3 }
  0x9e   : > { %v714_v43 = vpop.permute.xlu0 %713  ;;  %v716_v45 = vpop.permute.xlu1 %715 }
  0x9f   : > { %v720_v55 = vsel %vm719_vm7, %v714_v43, %v716_v45 }
  0xa0   : > { %1229 = vmatmul.mubr.msk.bf16.vlgmr.msra.gmra.mxu0 %vm202_vm3, %v1227_v37  ;;  %v726_v58 = vsel %vm206_vm1, %v720_v55, 0 }
  0xa1   : > { %535 = vmatpush1.bf16.msra.mxu0 %v512_v42  ;;  %552 = vmatprep.mubr.bf16.mxu0 %v1364_v6 }
  0xa2   : > { %1236 = vmatprep.subr.msk.bf16.mxu0 %vm206_vm1, %v614_v44  ;;  %v718_v49 = vpop.permute.xlu0 %717  ;;  %v821_v51 = vpop.permute.xlu1 %820 }
  0xa3   : > { %1296 = vmatmul.mubr.msk.bf16.vlgmr.msra.gmra.mxu1 %vm202_vm3, %v1231_v46  ;;  %v721_v52 = vsel %vm719_vm7, %v716_v45, %v718_v49  ;;  %v732_v56 = vsel %vm206_vm1, %v718_v49, 0 }
  0xa4   : > { %1300 = vmatpush3.bf16.msra.mxu1 %v625_v48  ;;  %1301 = vmatprep.mubr.msk.bf16.mxu1 %vm1363_vm0, %v1362_v3 }
  0xa5   : > { %1305 = vmatprep.subr.bf16.mxu1 %v1362_v3 }
  0xa6   : > { %v823_v53 = vpop.permute.xlu0 %822  ;;  %v825_v57 = vpop.permute.xlu1 %824 }
  0xa7   : > { %v828_v60 = vsel %vm826_vm8, %v823_v53, %v825_v57  ;;  %v827_v63 = vsel %vm826_vm8, %v821_v51, %v823_v53  ;;  %v839_v0 = vsel %vm206_vm1, %v825_v57, 0 }
  0xa8   : > { %1233 = vmatmul.mubr.msk.bf16.vlgmr.msra.gmra.mxu0 %vm202_vm3, %v1231_v46  ;;  %v833_v2 = vsel %vm206_vm1, %v827_v63, 0 }
  0xa9   : > { %642 = vmatpush1.bf16.msra.mxu0 %v619_v50  ;;  %659 = vmatprep.mubr.bf16.mxu0 %v1364_v6 }
  0xaa   : > { %1240 = vmatprep.subr.msk.bf16.mxu0 %vm206_vm1, %v721_v52  ;;  %v928_v59 = vpop.permute.xlu0 %927  ;;  %v930_v61 = vpop.permute.xlu1 %929 }
  0xab   : > { %1302 = vmatmul.mubr.msk.bf16.vlgmr.msra.gmra.mxu1 %vm202_vm3, %v1235_v54  ;;  %v934_v8 = vsel %vm933_vm9, %v928_v59, %v930_v61 }
  0xac   : > { %1306 = vmatpush3.bf16.msra.mxu1 %v732_v56  ;;  %1307 = vmatprep.mubr.msk.bf16.mxu1 %vm1363_vm0, %v1362_v3  ;;  %v940_v12 = vsel %vm206_vm1, %v934_v8, 0 }
  0xad   : > { %1311 = vmatprep.subr.bf16.mxu1 %v1362_v3 }
  0xae   : > { %v932_v1 = vpop.permute.xlu0 %931  ;;  %v1035_v4 = vpop.permute.xlu1 %1034 }
  0xaf   : > { %v935_v5 = vsel %vm933_vm9, %v930_v61, %v932_v1  ;;  %v946_v9 = vsel %vm206_vm1, %v932_v1, 0 }
  0xb0   : > { %1237 = vmatmul.mubr.msk.bf16.vlgmr.msra.gmra.mxu0 %vm202_vm3, %v1235_v54 }
  0xb1   : > { %749 = vmatpush1.bf16.msra.mxu0 %v726_v58  ;;  %766 = vmatprep.mubr.bf16.mxu0 %v1364_v6 }
  0xb2   : > { %1244 = vmatprep.subr.msk.bf16.mxu0 %vm206_vm1, %v828_v60  ;;  %v1037_v10 = vpop.permute.xlu0 %1036  ;;  %v1039_v11 = vpop.permute.xlu1 %1038 }
  0xb3   : > { %1308 = vmatmul.mubr.msk.bf16.vlgmr.msra.gmra.mxu1 %vm202_vm3, %v1239_v62  ;;  %v1042_v13 = vsel %vm1040_vm10, %v1037_v10, %v1039_v11  ;;  %v1041_v15 = vsel %vm1040_vm10, %v1035_v4, %v1037_v10  ;;  %v1053_v16 = vsel %vm206_vm1, %v1039_v11, 0 }
  0xb4   : > { %1312 = vmatpush3.bf16.msra.mxu1 %v839_v0  ;;  %1313 = vmatprep.mubr.msk.bf16.mxu1 %vm1363_vm0, %v1362_v3  ;;  %v1047_v17 = vsel %vm206_vm1, %v1041_v15, 0 }
  0xb5   : > { %1317 = vmatprep.subr.bf16.mxu1 %v1362_v3 }
  0xb8   : > { %1241 = vmatmul.mubr.msk.bf16.vlgmr.msra.gmra.mxu0 %vm202_vm3, %v1239_v62 }
  0xb9   : > { %856 = vmatpush1.bf16.msra.mxu0 %v833_v2  ;;  %873 = vmatprep.mubr.bf16.mxu0 %v1364_v6 }
  0xba   : > { %1248 = vmatprep.subr.msk.bf16.mxu0 %vm206_vm1, %v935_v5 }
  0xbb   : > { %1314 = vmatmul.mubr.msk.bf16.vlgmr.msra.gmra.mxu1 %vm202_vm3, %v1243_v7 }
  0xbc   : > { %1318 = vmatpush3.bf16.msra.mxu1 %v946_v9  ;;  %1319 = vmatprep.mubr.msk.bf16.mxu1 %vm1363_vm0, %v1362_v3 }
  0xbd   : > { %1323 = vmatprep.subr.bf16.mxu1 %v1362_v3 }
  0xc0   : > { %1245 = vmatmul.mubr.msk.bf16.vlgmr.msra.gmra.mxu0 %vm202_vm3, %v1243_v7 }
  0xc1   : > { %963 = vmatpush1.bf16.msra.mxu0 %v940_v12  ;;  %980 = vmatprep.mubr.bf16.mxu0 %v1364_v6 }
  0xc2   : > { %1252 = vmatprep.subr.msk.bf16.mxu0 %vm206_vm1, %v1042_v13 }
  0xc3   : > { %1320 = vmatmul.mubr.msk.bf16.vlgmr.msra.gmra.mxu1 %vm202_vm3, %v1247_v14 }
  0xc4   : > { %1324 = vmatpush3.bf16.msra.mxu1 %v1053_v16  ;;  %1325 = vmatprep.mubr.msk.bf16.mxu1 %vm1363_vm0, %v1362_v3 }
  0xc8   : > { %1249 = vmatmul.mubr.msk.bf16.vlgmr.msra.gmra.mxu0 %vm202_vm3, %v1247_v14 }
  0xc9   : > { %1070 = vmatpush1.bf16.msra.mxu0 %v1047_v17  ;;  %1087 = vmatprep.mubr.bf16.mxu0 %v1364_v6 }
  0xcb   : > { %1326 = vmatmul.mubr.msk.bf16.vlgmr.msra.gmra.mxu1 %vm202_vm3, %v1251_v18 }
  0xd0   : > { %1253 = vmatmul.mubr.msk.bf16.vlgmr.msra.gmra.mxu0 %vm202_vm3, %v1251_v18 }
 0x14b   : > { %v291_v19 = vpop.f32.mrf.mxu1 }
 0x14d   : > { %v1279_v20 = vpop.f32.mrf.mxu1 }
 0x14f   : > { %v294_v22 = vpop.f32.mrf.mxu1 }
 0x150   : > { %v250_v21 = vpop.f32.mrf.mxu0 }
 0x151   : > { %v1280_v24 = vpop.f32.mrf.mxu1 }
 0x152   : > { %v252_v23 = vpop.f32.mrf.mxu0 }
 0x153   : > { %v384_v25 = vpop.f32.mrf.mxu1 }
 0x154   : > { %v254_v3 = vpop.f32.mrf.mxu0  ;;  %v385_v4 = vadd.f32 %v384_v25, %v291_v19 }
 0x155   : > { %v1285_v27 = vpop.f32.mrf.mxu1 }
 0x156   : > { %v255_v26 = vpop.f32.mrf.mxu0 }
 0x157   : > { %v387_v6 = vpop.f32.mrf.mxu1 }
 0x158   : > { %v343_v28 = vpop.f32.mrf.mxu0 }
 0x159   : > { %v1286_v30 = vpop.f32.mrf.mxu1  ;;  %v344_v10 = vadd.f32 %v343_v28, %v250_v21 }
 0x15a   : > { %v345_v29 = vpop.f32.mrf.mxu0 }
 0x15b   : > { %v488_v32 = vpop.f32.mrf.mxu1  ;;  %v346_v14 = vadd.f32 %v345_v29, %v252_v23 }
 0x15c   : > { %v347_v31 = vpop.f32.mrf.mxu0  ;;  %v496_v8 = vadd.f32 %v488_v32, %v385_v4 }
 0x15d   : > { %v1291_v34 = vpop.f32.mrf.mxu1 }
 0x15e   : > { %v348_v33 = vpop.f32.mrf.mxu0 }
 0x15f   : > { %v491_v36 = vpop.f32.mrf.mxu1 }
 0x160   : > { %v447_v35 = vpop.f32.mrf.mxu0 }
 0x161   : > { %v1292_v38 = vpop.f32.mrf.mxu1  ;;  %v494_v15 = vadd.f32 %v447_v35, %v344_v10  ;;  %v1143_v35 = vpop.permute.xlu0 %1142 }
 0x162   : > { %v449_v37 = vpop.f32.mrf.mxu0 }
 0x163   : > { %v595_v40 = vpop.f32.mrf.mxu1  ;;  %v495_v20 = vadd.f32 %v449_v37, %v346_v14 }
 0x164   : > { %v451_v39 = vpop.f32.mrf.mxu0  ;;  %v603_v12 = vadd.f32 %v595_v40, %v496_v8 }
 0x165   : > { %v1297_v42 = vpop.f32.mrf.mxu1 }
 0x166   : > { %v452_v41 = vpop.f32.mrf.mxu0 }
 0x167   : > { %v598_v44 = vpop.f32.mrf.mxu1 }
 0x168   : > { %v554_v43 = vpop.f32.mrf.mxu0 }
 0x169   : > { %v1298_v46 = vpop.f32.mrf.mxu1  ;;  %v601_v22 = vadd.f32 %v554_v43, %v494_v15 }
 0x16a   : > { %v556_v45 = vpop.f32.mrf.mxu0 }
 0x16b   : > { %v702_v48 = vpop.f32.mrf.mxu1  ;;  %v602_v19 = vadd.f32 %v556_v45, %v495_v20 }
 0x16c   : > { %v558_v47 = vpop.f32.mrf.mxu0  ;;  %v710_v17 = vadd.f32 %v702_v48, %v603_v12 }
 0x16d   : > { %v1303_v50 = vpop.f32.mrf.mxu1 }
 0x16e   : > { %v559_v49 = vpop.f32.mrf.mxu0 }
 0x16f   : > { %v705_v52 = vpop.f32.mrf.mxu1 }
 0x170   : > { %v661_v51 = vpop.f32.mrf.mxu0 }
 0x171   : > { %v1304_v54 = vpop.f32.mrf.mxu1  ;;  %v708_v25 = vadd.f32 %v661_v51, %v601_v22 }
 0x172   : > { %v663_v53 = vpop.f32.mrf.mxu0 }
 0x173   : > { %v809_v56 = vpop.f32.mrf.mxu1  ;;  %v709_v21 = vadd.f32 %v663_v53, %v602_v19 }
 0x174   : > { %v665_v55 = vpop.f32.mrf.mxu0  ;;  %v817_v3 = vadd.f32 %v809_v56, %v710_v17 }
 0x175   : > { %v1309_v58 = vpop.f32.mrf.mxu1 }
 0x176   : > { %v666_v57 = vpop.f32.mrf.mxu0 }
 0x177   : > { %v812_v60 = vpop.f32.mrf.mxu1 }
 0x178   : > { %v768_v59 = vpop.f32.mrf.mxu0 }
 0x179   : > { %v1310_v62 = vpop.f32.mrf.mxu1  ;;  %v815_v28 = vadd.f32 %v768_v59, %v708_v25 }
 0x17a   : > { %v770_v61 = vpop.f32.mrf.mxu0 }
 0x17b   : > { %v916_v0 = vpop.f32.mrf.mxu1  ;;  %v816_v29 = vadd.f32 %v770_v61, %v709_v21 }
 0x17c   : > { %v772_v63 = vpop.f32.mrf.mxu0  ;;  %v924_v6 = vadd.f32 %v916_v0, %v817_v3 }
 0x17d   : > { %v1315_v2 = vpop.f32.mrf.mxu1 }
 0x17e   : > { %v773_v1 = vpop.f32.mrf.mxu0 }
 0x17f   : > { %v919_v7 = vpop.f32.mrf.mxu1 }
 0x180   : > { %v875_v5 = vpop.f32.mrf.mxu0 }
 0x181   : > { %v1316_v11 = vpop.f32.mrf.mxu1  ;;  %v922_v33 = vadd.f32 %v875_v5, %v815_v28 }
 0x182   : > { %v877_v9 = vpop.f32.mrf.mxu0 }
 0x183   : > { %v1023_v16 = vpop.f32.mrf.mxu1  ;;  %v923_v38 = vadd.f32 %v877_v9, %v816_v29 }
 0x184   : > { %v879_v13 = vpop.f32.mrf.mxu0  ;;  %v1031_v32 = vadd.f32 %v1023_v16, %v924_v6 }
 0x185   : > { %v1321_v24 = vpop.f32.mrf.mxu1 }
 0x186   : > { %v880_v18 = vpop.f32.mrf.mxu0 }
 0x187   : > { %v1026_v27 = vpop.f32.mrf.mxu1 }
 0x188   : > { %v982_v26 = vpop.f32.mrf.mxu0 }
 0x189   : > { %v1322_v31 = vpop.f32.mrf.mxu1  ;;  %v1029_v39 = vadd.f32 %v982_v26, %v922_v33 }
 0x18a   : > { %v984_v30 = vpop.f32.mrf.mxu0 }
 0x18b   : > { %v1130_v34 = vpop.f32.mrf.mxu1  ;;  %v1030_v43 = vadd.f32 %v984_v30, %v923_v38 }
 0x18c   : > { %v986_v23 = vpop.f32.mrf.mxu0  ;;  %v1138_v36 = vadd.f32 %v1130_v34, %v1031_v32 }
 0x18d   : > { %v1327_v40 = vpop.f32.mrf.mxu1 }
 0x18e   : > { %v987_v37 = vpop.f32.mrf.mxu0  ;;  %v1147_v41 = vadd.f32 %v1143_v35, %v1138_v36 }
 0x18f   : > { %v1133_v45 = vpop.f32.mrf.mxu1 }
 0x190   : > { %v1089_v42 = vpop.f32.mrf.mxu0  ;;  %v1150_v46 = vmax.f32 %v1147_v41, 0.0 }
 0x191   : > { %v1136_v44 = vadd.f32 %v1089_v42, %v1029_v39  ;;  %v1328_v50 = vpop.f32.mrf.mxu1 }
 0x192   : > { %v1091_v47 = vpop.f32.mrf.mxu0  ;;  %1157 = vst.msk [vmem:[%s170_s24 + $0x8] sm:$0xf] %vm1156_vm11, %v1150_v46 }
 0x193   : > { %v1145_v48 = vadd.f32 %v1143_v35, %v1136_v44  ;;  %v1137_v49 = vadd.f32 %v1091_v47, %v1030_v43 }
 0x194   : > { %v1093_v51 = vpop.f32.mrf.mxu0 }
 0x195   : > { %v1146_v52 = vadd.f32 %v1143_v35, %v1137_v49  ;;  %v1148_v54 = vmax.f32 %v1145_v48, 0.0 }
 0x196   : > { %v1094_v53 = vpop.f32.mrf.mxu0 }
 0x197   : > { %v1149_v55 = vmax.f32 %v1146_v52, 0.0 }
 0x199   : > { %v1153_v56 = vcombine.low %v1148_v54, %v1149_v55 }
 0x19b   : > { %1155 = vst [vmem:[%s170_s24] sm:$0xff] %v1153_v56 }
 0x19c PF: > { %s13_s12 = sadd.s32 1, %s1359_s12  }
 0x19d   : > { %p10_p4 = scmp.ge.s32.totalorder %s13_s12, 4  }
 0x19f   :  { %12 = sbr.rel (!%p10_p4) target bundleno = 1 (0x1), region = 70 }

// kernel: up_forward.4
= control target key start
LH: loop header
LB: loop body
LE: loop exit
PB: predicated region body
PF: predicated region fallthrough
CT: control target
= control target key end

     0   :  { %s2592_s18 = smov 0   ;;  %s3006_s0 = inlined_call_operand.vmem [shape: bf16[2,2,342], index: 0, kind: input, shape index: {}]   ;;  %s3007_s1 = inlined_call_operand.vmem [shape: bf16[2,2,342], index: 1, kind: input, shape index: {}]   ;;  %s3008_s2 = inlined_call_operand.vmem [shape: bf16[3,3,4,2], index: 2, kind: input, shape index: {}]   ;;  %s3009_s3 = inlined_call_operand.vmem [shape: bf16[3,3,4,2], index: 3, kind: input, shape index: {}]   ;;  %s3010_s4 = inlined_call_operand.vmem [shape: f32[4,1], index: 4, kind: input, shape index: {}]   ;;  %s3011_s5 = inlined_call_operand.vmem [shape: bf16[2,4,288], index: 5, kind: output, shape index: {}]  }
   0x1 LB: > { %s2292_s19 = sadd.s32 4294967295, %s2547_s18   ;;  %p2296_p0 = scmp.ge.s32.totalorder %s2547_s18, 1  ;;  %s2547_s18 = sphi %s2592_s18, %s15_s18  }
   0x2   : > { %p195_p1 = scmp.lt.s32.totalorder %s2547_s18, 3 }
   0x4   : > { %p196_p2 = pnand %p2296_p0, %p195_p1 }
   0x5   : > { %p226_p3 = scmp.lt.s32.totalorder (!%p196_p2), %s2292_s19, 1  ;;  %s2553_s24 = smov (!%p196_p2), 127  }
   0x6   : > { %199 = sbr.rel (%p196_p2) target bundleno = 488 (0x1e8), region = 40  ;;  %s2554_s25 = smov (!%p196_p2), 126  }
   0x7   : > { %s2555_s26 = smov (!%p196_p2), 110   ;;  %s2556_s27 = smov (!%p196_p2), 109  }
   0x8   : > { %s2557_s28 = smov (!%p196_p2), 108   ;;  %s2558_s29 = smov (!%p196_p2), 92  }
   0x9   : > { %s2559_s30 = smov (!%p196_p2), 91   ;;  %s2560_s9 = smov (!%p196_p2), 90  }
   0xb   : > { %v256_v0 = vlaneseq  ;;  %v2549_v1 = vmov 1966171168   ;;  %v2550_v3 = vmov 0.0   ;;  %s3013_s19 = smov (!%p226_p3, %s2292_s19), 1  ;;  %vm2551_vm0 = vmmov 0  }
   0xc   : > { %v254_v2 = vunpack.c.l.s4 %v2549_v1  ;;  %2409 = vmatprep.subr.bf16.mxu1 %v2550_v3  ;;  %2411 = vmatprep.mubr.msk.bf16.mxu1 %vm2551_vm0, %v2550_v3  ;;  %s2517_s20 = smul.u32 3, %s3013_s19  ;;  %v2552_v6 = vmov 0   ;;  %vm281_vm1 = vcmask 1040384   ;;  %vm274_vm2 = vcmask 1039360   ;;  %v2298_v22 = vld [vmem:[%s3008_s2 + $0x2] sm:$0x3] }
   0xd   : > { %v2603_v4 = vshrl.u32 %v256_v0, 7  ;;  %323 = vmatprep.mubr.bf16.mxu0 %v2552_v6  ;;  %2540 = vset.pattern.permute.xlu0 %v2552_v6  ;;  %vm277_vm3 = vcmask 15360   ;;  %vm473_vm4 = vcmask 1031168   ;;  %v241_v32 = vld [vmem:[%s3008_s2] sm:$0x3]  ;;  %vm580_vm5 = vcmask 900096  }
   0xe   : > { %v255_v5 = vunpack.c.0.s8 %v254_v2  ;;  %s229_s23 = scalar_lea.vmem %s3006_s0, %s2517_s20  ;;  %s233_s8 = scalar_lea.vmem %s3007_s1, %s2517_s20  ;;  %v2306_v41 = vld [vmem:[%s3008_s2 + $0x4] sm:$0x3]  ;;  %vm687_vm6 = vcmask 891904   ;;  %v2310_v50 = vld [vmem:[%s3008_s2 + $0x6] sm:$0x3]  ;;  %vm794_vm7 = vcmask 883712  }
   0xf   : > { %v2299_v8 = vld.sshfl [vmem:[%s229_s23] sm:$0x13 pattern:$0x75316420]  ;;  %v2314_v58 = vld [vmem:[%s3008_s2 + $0x8] sm:$0x3] }
  0x10   : > { %v258_v7 = vsub.s32 %v255_v5, %v2603_v4  ;;  %v252_v10 = vcombine.high %v2299_v8, %v2299_v8  ;;  %v2334_v13 = vld.sshfl [vmem:[%s233_s8] sm:$0x13 pattern:$0x75316420]  ;;  %vm901_vm8 = vcmask 752640   ;;  %vm1008_vm9 = vcmask 744448  }
  0x11   : > { %v1224_v14 = vcombine.high %v2334_v13, %v2334_v13  ;;  %v2318_v2 = vld [vmem:[%s3008_s2 + $0xa] sm:$0x3]  ;;  %vm1115_vm10 = vcmask 736256   ;;  %vm2219_vm11 = vcmask 1041408   ;;  %vm2220_vm12 = vcmask 1043458  }
  0x12   : > { %v2616_v9 = vrot.slane %v2299_v8, %v258_v7  ;;  %v2624_v12 = vrot.slane %v252_v10, %v258_v7  ;;  %v2675_v15 = vrot.slane %v2334_v13, %v258_v7  ;;  %vm2221_vm13 = vmor %vm2220_vm12, %vm2219_vm11  ;;  %vm2222_vm14 = vcmask 259076  }
  0x13   : > { %v2679_v16 = vrot.slane %v1224_v14, %v258_v7  ;;  %vm2223_vm15 = vmor %vm2222_vm14, %vm2221_vm13 }
  0x14   : > { %268 = vrot.lane.b32.xlu0 %v2616_v9, %s2553_s24  ;;  %v2622_v11 = vcombine.high %v2616_v9, %v2616_v9  ;;  %v2685_v17 = vcombine.high %v2675_v15, %v2675_v15  ;;  %v376_v28 = vsel %vm281_vm1, %v2616_v9, 0 }
  0x16   : > { %272 = vrot.lane.b32.xlu1 %v2622_v11, %s2553_s24  ;;  %v382_v25 = vsel %vm281_vm1, %v2622_v11, 0 }
  0x18   : > { %270 = vrot.lane.b32.xlu0 %v2624_v12, %s2553_s24 }
  0x1a   : > { %467 = vrot.lane.b32.xlu1 %v2616_v9, %s2554_s25 }
  0x1c   : > { %469 = vrot.lane.b32.xlu0 %v2624_v12, %s2554_s25 }
  0x1e   : > { %471 = vrot.lane.b32.xlu1 %v2622_v11, %s2554_s25 }
  0x20   : > { %574 = vrot.lane.b32.xlu0 %v2616_v9, %s2555_s26 }
  0x22   : > { %576 = vrot.lane.b32.xlu1 %v2624_v12, %s2555_s26 }
  0x24   : > { %578 = vrot.lane.b32.xlu0 %v2622_v11, %s2555_s26 }
  0x26   : > { %681 = vrot.lane.b32.xlu1 %v2616_v9, %s2556_s27 }
  0x28   : > { %683 = vrot.lane.b32.xlu0 %v2624_v12, %s2556_s27 }
  0x2a   : > { %685 = vrot.lane.b32.xlu1 %v2622_v11, %s2556_s27 }
  0x2c   : > { %788 = vrot.lane.b32.xlu0 %v2616_v9, %s2557_s28 }
  0x2e   : > { %790 = vrot.lane.b32.xlu1 %v2624_v12, %s2557_s28 }
  0x30   : > { %792 = vrot.lane.b32.xlu0 %v2622_v11, %s2557_s28 }
  0x32   : > { %895 = vrot.lane.b32.xlu1 %v2616_v9, %s2558_s29 }
  0x34   : > { %897 = vrot.lane.b32.xlu0 %v2624_v12, %s2558_s29 }
  0x36   : > { %899 = vrot.lane.b32.xlu1 %v2622_v11, %s2558_s29 }
  0x38   : > { %1002 = vrot.lane.b32.xlu0 %v2616_v9, %s2559_s30 }
  0x3a   : > { %1004 = vrot.lane.b32.xlu1 %v2624_v12, %s2559_s30 }
  0x3c   : > { %1006 = vrot.lane.b32.xlu0 %v2622_v11, %s2559_s30 }
  0x3e   : > { %1109 = vrot.lane.b32.xlu1 %v2616_v9, %s2560_s9 }
  0x40   : > { %1111 = vrot.lane.b32.xlu0 %v2624_v12, %s2560_s9 }
  0x42   : > { %1113 = vrot.lane.b32.xlu1 %v2622_v11, %s2560_s9 }
  0x44   : > { %1338 = vrot.lane.b32.xlu0 %v2675_v15, %s2553_s24 }
  0x46   : > { %1340 = vrot.lane.b32.xlu1 %v2679_v16, %s2553_s24 }
  0x48   : > { %1342 = vrot.lane.b32.xlu0 %v2685_v17, %s2553_s24 }
  0x4a   : > { %1444 = vrot.lane.b32.xlu1 %v2675_v15, %s2554_s25 }
  0x4c   : > { %1446 = vrot.lane.b32.xlu0 %v2679_v16, %s2554_s25 }
  0x4e   : > { %1448 = vrot.lane.b32.xlu1 %v2685_v17, %s2554_s25 }
  0x50   : > { %1550 = vrot.lane.b32.xlu0 %v2675_v15, %s2555_s26 }
  0x52   : > { %1552 = vrot.lane.b32.xlu1 %v2679_v16, %s2555_s26 }
  0x54   : > { %1554 = vrot.lane.b32.xlu0 %v2685_v17, %s2555_s26 }
  0x56   : > { %1656 = vrot.lane.b32.xlu1 %v2675_v15, %s2556_s27 }
  0x58   : > { %1658 = vrot.lane.b32.xlu0 %v2679_v16, %s2556_s27 }
  0x5a   : > { %1660 = vrot.lane.b32.xlu1 %v2685_v17, %s2556_s27  ;;  %s2518_s27 = smul.u32 6, %s3013_s19 }
  0x5c   : > { %1762 = vrot.lane.b32.xlu0 %v2675_v15, %s2557_s28 }
  0x5e   : > { %1764 = vrot.lane.b32.xlu1 %v2679_v16, %s2557_s28 }
  0x60   : > { %1766 = vrot.lane.b32.xlu0 %v2685_v17, %s2557_s28 }
  0x62   : > { %1868 = vrot.lane.b32.xlu1 %v2675_v15, %s2558_s29 }
  0x64   : > { %1870 = vrot.lane.b32.xlu0 %v2679_v16, %s2558_s29 }
  0x66   : > { %1872 = vrot.lane.b32.xlu1 %v2685_v17, %s2558_s29 }
  0x68   : > { %1974 = vrot.lane.b32.xlu0 %v2675_v15, %s2559_s30 }
  0x6a   : > { %1976 = vrot.lane.b32.xlu1 %v2679_v16, %s2559_s30 }
  0x6c   : > { %1978 = vrot.lane.b32.xlu0 %v2685_v17, %s2559_s30  ;;  %s238_s30 = scalar_lea.vmem %s3011_s5, %s2518_s27 }
  0x6e   : > { %2080 = vrot.lane.b32.xlu1 %v2675_v15, %s2560_s9 }
  0x70   : > { %2082 = vrot.lane.b32.xlu0 %v2679_v16, %s2560_s9 }
  0x72   : > { %2084 = vrot.lane.b32.xlu1 %v2685_v17, %s2560_s9 }
  0x86   : > { %v269_v18 = vpop.permute.xlu0 %268 }
  0x88   : > { %v273_v19 = vpop.permute.xlu1 %272 }
  0x89   : > { %v289_v20 = vsel %vm281_vm1, %v273_v19, 0 }
  0x8a   : > { %2410 = vmatpush3.bf16.msra.mxu1 %v289_v20  ;;  %v271_v21 = vpop.permute.xlu0 %270 }
  0x8b   : > { %v276_v23 = vsel %vm274_vm2, %v271_v21, %v273_v19  ;;  %v275_v24 = vsel %vm274_vm2, %v269_v18, %v271_v21  ;;  %2415 = vmatprep.subr.bf16.mxu1 %v2550_v3 }
  0x8c   : > { %2300 = vmatprep.subr.msk.bf16.mxu0 %vm281_vm1, %v276_v23  ;;  %v283_v26 = vsel %vm281_vm1, %v275_v24, 0  ;;  %v468_v27 = vpop.permute.xlu1 %467 }
  0x8d   : > { %306 = vmatpush1.bf16.msra.mxu0 %v283_v26  ;;  %2412 = vmatmul.mubr.msk.bf16.vlgmr.msra.gmra.mxu1 %vm277_vm3, %v2298_v22 }
  0x8e   : > { %2303 = vmatprep.subr.msk.bf16.mxu0 %vm281_vm1, %v2624_v12  ;;  %2416 = vmatpush3.bf16.msra.mxu1 %v382_v25  ;;  %v470_v29 = vpop.permute.xlu0 %469  ;;  %v2322_v12 = vld [vmem:[%s3008_s2 + $0xc] sm:$0x3] }
  0x8f   : > { %2417 = vmatprep.mubr.msk.bf16.mxu1 %vm2551_vm0, %v2550_v3  ;;  %2421 = vmatprep.subr.bf16.mxu1 %v2550_v3  ;;  %v474_v34 = vsel %vm473_vm4, %v468_v27, %v470_v29 }
  0x90   : > { %2301 = vmatmul.mubr.msk.bf16.vlgmr.msra.gmra.mxu0 %vm277_vm3, %v2298_v22  ;;  %v472_v30 = vpop.permute.xlu1 %471  ;;  %v480_v37 = vsel %vm281_vm1, %v474_v34, 0  ;;  %v2326_v22 = vld [vmem:[%s3008_s2 + $0xe] sm:$0x3] }
  0x91   : > { %399 = vmatpush1.bf16.msra.mxu0 %v376_v28  ;;  %v475_v31 = vsel %vm473_vm4, %v470_v29, %v472_v30  ;;  %416 = vmatprep.mubr.bf16.mxu0 %v2552_v6  ;;  %v486_v35 = vsel %vm281_vm1, %v472_v30, 0  ;;  %v2330_v28 = vld [vmem:[%s3008_s2 + $0x10] sm:$0x3]  ;;  %v1250_v29 = vsel %vm281_vm1, %v2685_v17, 0  ;;  %v1215_v17 = vld [vmem:[%s3009_s3] sm:$0x3] }
  0x92   : > { %2307 = vmatprep.subr.msk.bf16.mxu0 %vm281_vm1, %v475_v31  ;;  %v575_v33 = vpop.permute.xlu0 %574  ;;  %v1244_v31 = vsel %vm281_vm1, %v2675_v15, 0 }
  0x94   : > { %v577_v36 = vpop.permute.xlu1 %576 }
  0x95   : > { %2418 = vmatmul.mubr.msk.bf16.vlgmr.msra.gmra.mxu1 %vm277_vm3, %v241_v32  ;;  %v581_v43 = vsel %vm580_vm5, %v575_v33, %v577_v36 }
  0x96   : > { %2422 = vmatpush3.bf16.msra.mxu1 %v486_v35  ;;  %2423 = vmatprep.mubr.msk.bf16.mxu1 %vm2551_vm0, %v2550_v3  ;;  %v579_v38 = vpop.permute.xlu0 %578  ;;  %v587_v46 = vsel %vm281_vm1, %v581_v43, 0  ;;  %v2184_v43 = vld [vmem:[%s3010_s4] sm:$0xf] }
  0x97   : > { %v582_v39 = vsel %vm580_vm5, %v577_v36, %v579_v38  ;;  %2427 = vmatprep.subr.bf16.mxu1 %v2550_v3  ;;  %v593_v44 = vsel %vm281_vm1, %v579_v38, 0  ;;  %2187 = vperm.xlu0 %2540, %v2184_v43  }
  0x98   : > { %2304 = vmatmul.mubr.msk.bf16.vlgmr.msra.gmra.mxu0 %vm277_vm3, %v241_v32  ;;  %v682_v40 = vpop.permute.xlu1 %681 }
  0x99   : > { %503 = vmatpush1.bf16.msra.mxu0 %v480_v37  ;;  %520 = vmatprep.mubr.bf16.mxu0 %v2552_v6 }
  0x9a   : > { %2311 = vmatprep.subr.msk.bf16.mxu0 %vm281_vm1, %v582_v39  ;;  %v684_v42 = vpop.permute.xlu0 %683 }
  0x9b   : > { %v688_v51 = vsel %vm687_vm6, %v682_v40, %v684_v42  ;;  %v2338_v40 = vld [vmem:[%s3009_s3 + $0x2] sm:$0x3] }
  0x9c   : > { %v686_v45 = vpop.permute.xlu1 %685  ;;  %v694_v54 = vsel %vm281_vm1, %v688_v51, 0 }
  0x9d   : > { %2424 = vmatmul.mubr.msk.bf16.vlgmr.msra.gmra.mxu1 %vm277_vm3, %v2306_v41  ;;  %v689_v48 = vsel %vm687_vm6, %v684_v42, %v686_v45  ;;  %v700_v52 = vsel %vm281_vm1, %v686_v45, 0 }
  0x9e   : > { %2428 = vmatpush3.bf16.msra.mxu1 %v593_v44  ;;  %2429 = vmatprep.mubr.msk.bf16.mxu1 %vm2551_vm0, %v2550_v3  ;;  %v789_v47 = vpop.permute.xlu0 %788 }
  0x9f   : > { %2433 = vmatprep.subr.bf16.mxu1 %v2550_v3 }
  0xa0   : > { %2308 = vmatmul.mubr.msk.bf16.vlgmr.msra.gmra.mxu0 %vm277_vm3, %v2306_v41  ;;  %v791_v49 = vpop.permute.xlu1 %790 }
  0xa1   : > { %610 = vmatpush1.bf16.msra.mxu0 %v587_v46  ;;  %627 = vmatprep.mubr.bf16.mxu0 %v2552_v6  ;;  %v795_v59 = vsel %vm794_vm7, %v789_v47, %v791_v49 }
  0xa2   : > { %2315 = vmatprep.subr.msk.bf16.mxu0 %vm281_vm1, %v689_v48  ;;  %v793_v53 = vpop.permute.xlu0 %792  ;;  %v801_v62 = vsel %vm281_vm1, %v795_v59, 0 }
  0xa3   : > { %v796_v56 = vsel %vm794_vm7, %v791_v49, %v793_v53  ;;  %v807_v60 = vsel %vm281_vm1, %v793_v53, 0  ;;  %v2342_v49 = vld [vmem:[%s3009_s3 + $0x4] sm:$0x3] }
  0xa4   : > { %v896_v55 = vpop.permute.xlu1 %895 }
  0xa5   : > { %2430 = vmatmul.mubr.msk.bf16.vlgmr.msra.gmra.mxu1 %vm277_vm3, %v2310_v50 }
  0xa6   : > { %2434 = vmatpush3.bf16.msra.mxu1 %v700_v52  ;;  %2435 = vmatprep.mubr.msk.bf16.mxu1 %vm2551_vm0, %v2550_v3  ;;  %v898_v57 = vpop.permute.xlu0 %897 }
  0xa7   : > { %2439 = vmatprep.subr.bf16.mxu1 %v2550_v3  ;;  %v902_v5 = vsel %vm901_vm8, %v896_v55, %v898_v57 }
  0xa8   : > { %2312 = vmatmul.mubr.msk.bf16.vlgmr.msra.gmra.mxu0 %vm277_vm3, %v2310_v50  ;;  %v900_v61 = vpop.permute.xlu1 %899  ;;  %v908_v9 = vsel %vm281_vm1, %v902_v5, 0 }
  0xa9   : > { %717 = vmatpush1.bf16.msra.mxu0 %v694_v54  ;;  %734 = vmatprep.mubr.bf16.mxu0 %v2552_v6  ;;  %v903_v0 = vsel %vm901_vm8, %v898_v57, %v900_v61  ;;  %v914_v7 = vsel %vm281_vm1, %v900_v61, 0  ;;  %v2346_v57 = vld [vmem:[%s3009_s3 + $0x6] sm:$0x3] }
  0xaa   : > { %2319 = vmatprep.subr.msk.bf16.mxu0 %vm281_vm1, %v796_v56  ;;  %v1003_v63 = vpop.permute.xlu0 %1002 }
  0xac   : > { %v1005_v1 = vpop.permute.xlu1 %1004 }
  0xad   : > { %2436 = vmatmul.mubr.msk.bf16.vlgmr.msra.gmra.mxu1 %vm277_vm3, %v2314_v58  ;;  %v1009_v13 = vsel %vm1008_vm9, %v1003_v63, %v1005_v1 }
  0xae   : > { %2440 = vmatpush3.bf16.msra.mxu1 %v807_v60  ;;  %2441 = vmatprep.mubr.msk.bf16.mxu1 %vm2551_vm0, %v2550_v3  ;;  %v1007_v8 = vpop.permute.xlu0 %1006  ;;  %v1015_v20 = vsel %vm281_vm1, %v1009_v13, 0 }
  0xaf   : > { %2445 = vmatprep.subr.bf16.mxu1 %v2550_v3  ;;  %v1010_v11 = vsel %vm1008_vm9, %v1005_v1, %v1007_v8  ;;  %v1021_v14 = vsel %vm281_vm1, %v1007_v8, 0  ;;  %v2350_v1 = vld [vmem:[%s3009_s3 + $0x8] sm:$0x3] }
  0xb0   : > { %2316 = vmatmul.mubr.msk.bf16.vlgmr.msra.gmra.mxu0 %vm277_vm3, %v2314_v58  ;;  %v1110_v10 = vpop.permute.xlu1 %1109 }
  0xb1   : > { %824 = vmatpush1.bf16.msra.mxu0 %v801_v62  ;;  %841 = vmatprep.mubr.bf16.mxu0 %v2552_v6 }
  0xb2   : > { %2323 = vmatprep.subr.msk.bf16.mxu0 %vm281_vm1, %v903_v0  ;;  %v1112_v18 = vpop.permute.xlu0 %1111 }
  0xb3   : > { %v1116_v23 = vsel %vm1115_vm10, %v1110_v10, %v1112_v18 }
  0xb4   : > { %v1114_v19 = vpop.permute.xlu1 %1113  ;;  %v1122_v25 = vsel %vm281_vm1, %v1116_v23, 0 }
  0xb5   : > { %2442 = vmatmul.mubr.msk.bf16.vlgmr.msra.gmra.mxu1 %vm277_vm3, %v2318_v2  ;;  %v1117_v21 = vsel %vm1115_vm10, %v1112_v18, %v1114_v19  ;;  %v1128_v24 = vsel %vm281_vm1, %v1114_v19, 0 }
  0xb6   : > { %2446 = vmatpush3.bf16.msra.mxu1 %v914_v7  ;;  %2447 = vmatprep.mubr.msk.bf16.mxu1 %vm2551_vm0, %v2550_v3  ;;  %v1339_v26 = vpop.permute.xlu0 %1338 }
  0xb7   : > { %2451 = vmatprep.subr.bf16.mxu1 %v2550_v3 }
  0xb8   : > { %2320 = vmatmul.mubr.msk.bf16.vlgmr.msra.gmra.mxu0 %vm277_vm3, %v2318_v2  ;;  %v1341_v27 = vpop.permute.xlu1 %1340 }
  0xb9   : > { %931 = vmatpush1.bf16.msra.mxu0 %v908_v9  ;;  %948 = vmatprep.mubr.bf16.mxu0 %v2552_v6  ;;  %v1344_v15 = vsel %vm274_vm2, %v1339_v26, %v1341_v27 }
  0xba   : > { %2327 = vmatprep.subr.msk.bf16.mxu0 %vm281_vm1, %v1010_v11  ;;  %v1343_v30 = vpop.permute.xlu0 %1342  ;;  %v1350_v36 = vsel %vm281_vm1, %v1344_v15, 0 }
  0xbb   : > { %v1345_v33 = vsel %vm274_vm2, %v1341_v27, %v1343_v30  ;;  %v1356_v34 = vsel %vm281_vm1, %v1343_v30, 0 }
  0xbc   : > { %v1445_v32 = vpop.permute.xlu1 %1444 }
  0xbd   : > { %2448 = vmatmul.mubr.msk.bf16.vlgmr.msra.gmra.mxu1 %vm277_vm3, %v2322_v12 }
  0xbe   : > { %2452 = vmatpush3.bf16.msra.mxu1 %v1021_v14  ;;  %2453 = vmatprep.mubr.msk.bf16.mxu1 %vm2551_vm0, %v2550_v3 }
  0xbf   : > { %2457 = vmatprep.subr.bf16.mxu1 %v2550_v3 }
  0xc0   : > { %2324 = vmatmul.mubr.msk.bf16.vlgmr.msra.gmra.mxu0 %vm277_vm3, %v2322_v12  ;;  %v1449_v35 = vpop.permute.xlu1 %1448  ;;  %v2354_v12 = vld [vmem:[%s3009_s3 + $0xa] sm:$0x3] }
  0xc1   : > { %1038 = vmatpush1.bf16.msra.mxu0 %v1015_v20  ;;  %1055 = vmatprep.mubr.bf16.mxu0 %v2552_v6  ;;  %v1462_v42 = vsel %vm281_vm1, %v1449_v35, 0 }
  0xc2   : > { %2331 = vmatprep.subr.msk.bf16.mxu0 %vm281_vm1, %v1117_v21 }
  0xc4   : > { %v1553_v39 = vpop.permute.xlu1 %1552 }
  0xc5   : > { %2454 = vmatmul.mubr.msk.bf16.vlgmr.msra.gmra.mxu1 %vm277_vm3, %v2326_v22 }
  0xc6   : > { %2458 = vmatpush3.bf16.msra.mxu1 %v1128_v24  ;;  %2459 = vmatprep.mubr.msk.bf16.mxu1 %vm2551_vm0, %v2550_v3 }
  0xc7   : > { %2463 = vmatprep.subr.bf16.mxu1 %v2550_v3 }
  0xc8   : > { %2328 = vmatmul.mubr.msk.bf16.vlgmr.msra.gmra.mxu0 %vm277_vm3, %v2326_v22  ;;  %v1657_v46 = vpop.permute.xlu1 %1656  ;;  %v2358_v22 = vld [vmem:[%s3009_s3 + $0xc] sm:$0x3] }
  0xc9   : > { %1145 = vmatpush1.bf16.msra.mxu0 %v1122_v25  ;;  %1162 = vmatprep.mubr.bf16.mxu0 %v2552_v6 }
  0xca   : > { %2335 = vmatprep.subr.msk.bf16.mxu0 %vm281_vm1, %v2679_v16  ;;  %v1447_v16 = vpop.permute.xlu0 %1446 }
  0xcb   : > { %v1451_v38 = vsel %vm473_vm4, %v1447_v16, %v1449_v35  ;;  %v1450_v41 = vsel %vm473_vm4, %v1445_v32, %v1447_v16 }
  0xcc   : > { %v1456_v45 = vsel %vm281_vm1, %v1450_v41, 0  ;;  %v1661_v52 = vpop.permute.xlu1 %1660 }
  0xcd   : > { %2460 = vmatmul.mubr.msk.bf16.vlgmr.msra.gmra.mxu1 %vm277_vm3, %v2330_v28  ;;  %v1674_v59 = vsel %vm281_vm1, %v1661_v52, 0 }
  0xce   : > { %2464 = vmatpush3.bf16.msra.mxu1 %v1250_v29  ;;  %2465 = vmatprep.mubr.msk.bf16.mxu1 %vm2551_vm0, %v2550_v3  ;;  %v1551_v37 = vpop.permute.xlu0 %1550  ;;  %v2362_v29 = vld [vmem:[%s3009_s3 + $0xe] sm:$0x3] }
  0xcf   : > { %2469 = vmatprep.subr.bf16.mxu1 %v2550_v3  ;;  %v1556_v50 = vsel %vm580_vm5, %v1551_v37, %v1553_v39 }
  0xd0   : > { %2332 = vmatmul.mubr.msk.bf16.vlgmr.msra.gmra.mxu0 %vm277_vm3, %v2330_v28  ;;  %v1562_v53 = vsel %vm281_vm1, %v1556_v50, 0  ;;  %v1765_v56 = vpop.permute.xlu1 %1764 }
  0xd1   : > { %1267 = vmatpush1.bf16.msra.mxu0 %v1244_v31  ;;  %1284 = vmatprep.mubr.bf16.mxu0 %v2552_v6 }
  0xd2   : > { %2339 = vmatprep.subr.msk.bf16.mxu0 %vm281_vm1, %v1345_v33  ;;  %v1555_v44 = vpop.permute.xlu0 %1554  ;;  %v2366_v33 = vld [vmem:[%s3009_s3 + $0x10] sm:$0x3] }
  0xd3   : > { %v1557_v47 = vsel %vm580_vm5, %v1553_v39, %v1555_v44  ;;  %v1568_v51 = vsel %vm281_vm1, %v1555_v44, 0 }
  0xd4   : > { %v1869_v62 = vpop.permute.xlu1 %1868 }
  0xd5   : > { %2466 = vmatmul.mubr.msk.bf16.vlgmr.msra.gmra.mxu1 %vm277_vm3, %v1215_v17 }
  0xd6   : > { %2470 = vmatpush3.bf16.msra.mxu1 %v1356_v34  ;;  %2471 = vmatprep.mubr.msk.bf16.mxu1 %vm2551_vm0, %v2550_v3  ;;  %v1659_v48 = vpop.permute.xlu0 %1658 }
  0xd7   : > { %2475 = vmatprep.subr.bf16.mxu1 %v2550_v3  ;;  %v1663_v55 = vsel %vm687_vm6, %v1659_v48, %v1661_v52  ;;  %v1662_v58 = vsel %vm687_vm6, %v1657_v46, %v1659_v48 }
  0xd8   : > { %2336 = vmatmul.mubr.msk.bf16.vlgmr.msra.gmra.mxu0 %vm277_vm3, %v1215_v17  ;;  %v1668_v61 = vsel %vm281_vm1, %v1662_v58, 0  ;;  %v1873_v7 = vpop.permute.xlu1 %1872 }
  0xd9   : > { %1373 = vmatpush1.bf16.msra.mxu0 %v1350_v36  ;;  %1390 = vmatprep.mubr.bf16.mxu0 %v2552_v6  ;;  %v1886_v14 = vsel %vm281_vm1, %v1873_v7, 0 }
  0xda   : > { %2343 = vmatprep.subr.msk.bf16.mxu0 %vm281_vm1, %v1451_v38  ;;  %v1763_v54 = vpop.permute.xlu0 %1762 }
  0xdb   : > { %v1768_v2 = vsel %vm794_vm7, %v1763_v54, %v1765_v56 }
  0xdc   : > { %v1774_v8 = vsel %vm281_vm1, %v1768_v2, 0  ;;  %v1977_v11 = vpop.permute.xlu1 %1976 }
  0xdd   : > { %2472 = vmatmul.mubr.msk.bf16.vlgmr.msra.gmra.mxu1 %vm277_vm3, %v2338_v40 }
  0xde   : > { %2476 = vmatpush3.bf16.msra.mxu1 %v1462_v42  ;;  %2477 = vmatprep.mubr.msk.bf16.mxu1 %vm2551_vm0, %v2550_v3  ;;  %v1767_v60 = vpop.permute.xlu0 %1766 }
  0xdf   : > { %2481 = vmatprep.subr.bf16.mxu1 %v2550_v3  ;;  %v1769_v63 = vsel %vm794_vm7, %v1765_v56, %v1767_v60  ;;  %v1780_v5 = vsel %vm281_vm1, %v1767_v60, 0 }
  0xe0   : > { %2340 = vmatmul.mubr.msk.bf16.vlgmr.msra.gmra.mxu0 %vm277_vm3, %v2338_v40  ;;  %v2081_v20 = vpop.permute.xlu1 %2080 }
  0xe1   : > { %1479 = vmatpush1.bf16.msra.mxu0 %v1456_v45  ;;  %1496 = vmatprep.mubr.bf16.mxu0 %v2552_v6 }
  0xe2   : > { %2347 = vmatprep.subr.msk.bf16.mxu0 %vm281_vm1, %v1557_v47  ;;  %v1871_v0 = vpop.permute.xlu0 %1870 }
  0xe3   : > { %v1875_v10 = vsel %vm901_vm8, %v1871_v0, %v1873_v7  ;;  %v1874_v13 = vsel %vm901_vm8, %v1869_v62, %v1871_v0 }
  0xe4   : > { %v1880_v19 = vsel %vm281_vm1, %v1874_v13, 0  ;;  %v2085_v26 = vpop.permute.xlu1 %2084 }
  0xe5   : > { %2478 = vmatmul.mubr.msk.bf16.vlgmr.msra.gmra.mxu1 %vm277_vm3, %v2342_v49  ;;  %v2098_v31 = vsel %vm281_vm1, %v2085_v26, 0 }
  0xe6   : > { %2482 = vmatpush3.bf16.msra.mxu1 %v1568_v51  ;;  %2483 = vmatprep.mubr.msk.bf16.mxu1 %vm2551_vm0, %v2550_v3  ;;  %v1975_v9 = vpop.permute.xlu0 %1974 }
  0xe7   : > { %2487 = vmatprep.subr.bf16.mxu1 %v2550_v3  ;;  %v1980_v23 = vsel %vm1008_vm9, %v1975_v9, %v1977_v11 }
  0xe8   : > { %2344 = vmatmul.mubr.msk.bf16.vlgmr.msra.gmra.mxu0 %vm277_vm3, %v2342_v49  ;;  %v1986_v27 = vsel %vm281_vm1, %v1980_v23, 0 }
  0xe9   : > { %1585 = vmatpush1.bf16.msra.mxu0 %v1562_v53  ;;  %1602 = vmatprep.mubr.bf16.mxu0 %v2552_v6 }
  0xea   : > { %2351 = vmatprep.subr.msk.bf16.mxu0 %vm281_vm1, %v1663_v55  ;;  %v1979_v18 = vpop.permute.xlu0 %1978 }
  0xeb   : > { %v1981_v21 = vsel %vm1008_vm9, %v1977_v11, %v1979_v18  ;;  %v1992_v24 = vsel %vm281_vm1, %v1979_v18, 0 }
  0xed   : > { %2484 = vmatmul.mubr.msk.bf16.vlgmr.msra.gmra.mxu1 %vm277_vm3, %v2346_v57 }
  0xee   : > { %2488 = vmatpush3.bf16.msra.mxu1 %v1674_v59  ;;  %2489 = vmatprep.mubr.msk.bf16.mxu1 %vm2551_vm0, %v2550_v3  ;;  %v2083_v25 = vpop.permute.xlu0 %2082 }
  0xef   : > { %2493 = vmatprep.subr.bf16.mxu1 %v2550_v3  ;;  %v2087_v28 = vsel %vm1115_vm10, %v2083_v25, %v2085_v26  ;;  %v2086_v30 = vsel %vm1115_vm10, %v2081_v20, %v2083_v25 }
  0xf0   : > { %2348 = vmatmul.mubr.msk.bf16.vlgmr.msra.gmra.mxu0 %vm277_vm3, %v2346_v57  ;;  %v2092_v32 = vsel %vm281_vm1, %v2086_v30, 0 }
  0xf1   : > { %1691 = vmatpush1.bf16.msra.mxu0 %v1668_v61  ;;  %1708 = vmatprep.mubr.bf16.mxu0 %v2552_v6 }
  0xf2   : > { %2355 = vmatprep.subr.msk.bf16.mxu0 %vm281_vm1, %v1769_v63 }
  0xf5   : > { %2490 = vmatmul.mubr.msk.bf16.vlgmr.msra.gmra.mxu1 %vm277_vm3, %v2350_v1 }
  0xf6   : > { %2494 = vmatpush3.bf16.msra.mxu1 %v1780_v5  ;;  %2495 = vmatprep.mubr.msk.bf16.mxu1 %vm2551_vm0, %v2550_v3 }
  0xf7   : > { %2499 = vmatprep.subr.bf16.mxu1 %v2550_v3 }
  0xf8   : > { %2352 = vmatmul.mubr.msk.bf16.vlgmr.msra.gmra.mxu0 %vm277_vm3, %v2350_v1 }
  0xf9   : > { %1797 = vmatpush1.bf16.msra.mxu0 %v1774_v8  ;;  %1814 = vmatprep.mubr.bf16.mxu0 %v2552_v6 }
  0xfa   : > { %2359 = vmatprep.subr.msk.bf16.mxu0 %vm281_vm1, %v1875_v10 }
  0xfd   : > { %2496 = vmatmul.mubr.msk.bf16.vlgmr.msra.gmra.mxu1 %vm277_vm3, %v2354_v12 }
  0xfe   : > { %2500 = vmatpush3.bf16.msra.mxu1 %v1886_v14  ;;  %2501 = vmatprep.mubr.msk.bf16.mxu1 %vm2551_vm0, %v2550_v3 }
  0xff   : > { %2505 = vmatprep.subr.bf16.mxu1 %v2550_v3 }
 0x100   : > { %2356 = vmatmul.mubr.msk.bf16.vlgmr.msra.gmra.mxu0 %vm277_vm3, %v2354_v12 }
 0x101   : > { %1903 = vmatpush1.bf16.msra.mxu0 %v1880_v19  ;;  %1920 = vmatprep.mubr.bf16.mxu0 %v2552_v6 }
 0x102   : > { %2363 = vmatprep.subr.msk.bf16.mxu0 %vm281_vm1, %v1981_v21 }
 0x105   : > { %2502 = vmatmul.mubr.msk.bf16.vlgmr.msra.gmra.mxu1 %vm277_vm3, %v2358_v22 }
 0x106   : > { %2506 = vmatpush3.bf16.msra.mxu1 %v1992_v24  ;;  %2507 = vmatprep.mubr.msk.bf16.mxu1 %vm2551_vm0, %v2550_v3 }
 0x107   : > { %2511 = vmatprep.subr.bf16.mxu1 %v2550_v3 }
 0x108   : > { %2360 = vmatmul.mubr.msk.bf16.vlgmr.msra.gmra.mxu0 %vm277_vm3, %v2358_v22 }
 0x109   : > { %2009 = vmatpush1.bf16.msra.mxu0 %v1986_v27  ;;  %2026 = vmatprep.mubr.bf16.mxu0 %v2552_v6 }
 0x10a   : > { %2367 = vmatprep.subr.msk.bf16.mxu0 %vm281_vm1, %v2087_v28 }
 0x10d   : > { %2508 = vmatmul.mubr.msk.bf16.vlgmr.msra.gmra.mxu1 %vm277_vm3, %v2362_v29 }
 0x10e   : > { %2512 = vmatpush3.bf16.msra.mxu1 %v2098_v31  ;;  %2513 = vmatprep.mubr.msk.bf16.mxu1 %vm2551_vm0, %v2550_v3 }
 0x110   : > { %2364 = vmatmul.mubr.msk.bf16.vlgmr.msra.gmra.mxu0 %vm277_vm3, %v2362_v29 }
 0x111   : > { %2115 = vmatpush1.bf16.msra.mxu0 %v2092_v32  ;;  %2132 = vmatprep.mubr.bf16.mxu0 %v2552_v6 }
 0x115   : > { %2514 = vmatmul.mubr.msk.bf16.vlgmr.msra.gmra.mxu1 %vm277_vm3, %v2366_v33 }
 0x118   : > { %2368 = vmatmul.mubr.msk.bf16.vlgmr.msra.gmra.mxu0 %vm277_vm3, %v2366_v33 }
 0x14d   : > { %v366_v16 = vpop.f32.mrf.mxu1 }
 0x14f   : > { %v2413_v17 = vpop.f32.mrf.mxu1 }
 0x150   : > { %v325_v15 = vpop.f32.mrf.mxu0 }
 0x151   : > { %v369_v34 = vpop.f32.mrf.mxu1 }
 0x152   : > { %v327_v35 = vpop.f32.mrf.mxu0 }
 0x153   : > { %v2414_v36 = vpop.f32.mrf.mxu1 }
 0x154   : > { %v329_v3 = vpop.f32.mrf.mxu0 }
 0x155   : > { %v459_v37 = vpop.f32.mrf.mxu1 }
 0x156   : > { %v460_v38 = vadd.f32 %v459_v37, %v366_v16  ;;  %v330_v39 = vpop.f32.mrf.mxu0 }
 0x157   : > { %v2419_v40 = vpop.f32.mrf.mxu1 }
 0x158   : > { %v418_v6 = vpop.f32.mrf.mxu0 }
 0x159   : > { %v419_v41 = vadd.f32 %v418_v6, %v325_v15  ;;  %v462_v42 = vpop.f32.mrf.mxu1 }
 0x15a   : > { %v420_v43 = vpop.f32.mrf.mxu0 }
 0x15b   : > { %v421_v44 = vadd.f32 %v420_v43, %v327_v35  ;;  %v2420_v45 = vpop.f32.mrf.mxu1 }
 0x15c   : > { %v422_v46 = vpop.f32.mrf.mxu0 }
 0x15d   : > { %v563_v47 = vpop.f32.mrf.mxu1 }
 0x15e   : > { %v571_v48 = vadd.f32 %v563_v47, %v460_v38  ;;  %v423_v49 = vpop.f32.mrf.mxu0 }
 0x15f   : > { %v2425_v50 = vpop.f32.mrf.mxu1 }
 0x160   : > { %v522_v51 = vpop.f32.mrf.mxu0 }
 0x161   : > { %v569_v52 = vadd.f32 %v522_v51, %v419_v41  ;;  %v566_v53 = vpop.f32.mrf.mxu1 }
 0x162   : > { %v524_v54 = vpop.f32.mrf.mxu0 }
 0x163   : > { %v570_v55 = vadd.f32 %v524_v54, %v421_v44  ;;  %v2426_v56 = vpop.f32.mrf.mxu1 }
 0x164   : > { %v526_v57 = vpop.f32.mrf.mxu0 }
 0x165   : > { %v670_v58 = vpop.f32.mrf.mxu1 }
 0x166   : > { %v678_v59 = vadd.f32 %v670_v58, %v571_v48  ;;  %v527_v60 = vpop.f32.mrf.mxu0 }
 0x167   : > { %v2431_v61 = vpop.f32.mrf.mxu1 }
 0x168   : > { %v629_v62 = vpop.f32.mrf.mxu0 }
 0x169   : > { %v676_v63 = vadd.f32 %v629_v62, %v569_v52  ;;  %v673_v0 = vpop.f32.mrf.mxu1 }
 0x16a   : > { %v631_v1 = vpop.f32.mrf.mxu0 }
 0x16b   : > { %v677_v2 = vadd.f32 %v631_v1, %v570_v55  ;;  %v2432_v5 = vpop.f32.mrf.mxu1 }
 0x16c   : > { %v633_v7 = vpop.f32.mrf.mxu0 }
 0x16d   : > { %v777_v8 = vpop.f32.mrf.mxu1 }
 0x16e   : > { %v785_v9 = vadd.f32 %v777_v8, %v678_v59  ;;  %v634_v10 = vpop.f32.mrf.mxu0 }
 0x16f   : > { %v2437_v11 = vpop.f32.mrf.mxu1 }
 0x170   : > { %v736_v12 = vpop.f32.mrf.mxu0 }
 0x171   : > { %v783_v13 = vadd.f32 %v736_v12, %v676_v63  ;;  %v780_v14 = vpop.f32.mrf.mxu1 }
 0x172   : > { %v738_v18 = vpop.f32.mrf.mxu0 }
 0x173   : > { %v784_v19 = vadd.f32 %v738_v18, %v677_v2  ;;  %v2438_v20 = vpop.f32.mrf.mxu1 }
 0x174   : > { %v740_v21 = vpop.f32.mrf.mxu0 }
 0x175   : > { %v884_v22 = vpop.f32.mrf.mxu1 }
 0x176   : > { %v892_v23 = vadd.f32 %v884_v22, %v785_v9  ;;  %v741_v24 = vpop.f32.mrf.mxu0 }
 0x177   : > { %v2443_v25 = vpop.f32.mrf.mxu1 }
 0x178   : > { %v843_v26 = vpop.f32.mrf.mxu0 }
 0x179   : > { %v890_v27 = vadd.f32 %v843_v26, %v783_v13  ;;  %v887_v28 = vpop.f32.mrf.mxu1 }
 0x17a   : > { %v845_v29 = vpop.f32.mrf.mxu0 }
 0x17b   : > { %v891_v30 = vadd.f32 %v845_v29, %v784_v19  ;;  %v2444_v31 = vpop.f32.mrf.mxu1 }
 0x17c   : > { %v847_v32 = vpop.f32.mrf.mxu0 }
 0x17d   : > { %v991_v33 = vpop.f32.mrf.mxu1 }
 0x17e   : > { %v999_v16 = vadd.f32 %v991_v33, %v892_v23  ;;  %v848_v17 = vpop.f32.mrf.mxu0 }
 0x17f   : > { %v2449_v15 = vpop.f32.mrf.mxu1 }
 0x180   : > { %v950_v34 = vpop.f32.mrf.mxu0 }
 0x181   : > { %v2986_v35 = vadd.f32 %v950_v34, %v890_v27  ;;  %v994_v36 = vpop.f32.mrf.mxu1 }
 0x182   : > { %v952_v3 = vpop.f32.mrf.mxu0 }
 0x183   : > { %v2988_v37 = vadd.f32 %v952_v3, %v891_v30  ;;  %v2450_v38 = vpop.f32.mrf.mxu1 }
 0x184   : > { %v954_v39 = vpop.f32.mrf.mxu0 }
 0x185   : > { %v1098_v40 = vpop.f32.mrf.mxu1 }
 0x186   : > { %v2990_v6 = vadd.f32 %v1098_v40, %v999_v16  ;;  %v955_v41 = vpop.f32.mrf.mxu0 }
 0x187   : > { %v2455_v42 = vpop.f32.mrf.mxu1 }
 0x188   : > { %v1057_v43 = vpop.f32.mrf.mxu0 }
 0x189   : > { %v1101_v44 = vpop.f32.mrf.mxu1 }
 0x18a   : > { %v2992_v45 = vpop.f32.mrf.mxu0 }
 0x18b   : > { %v2456_v46 = vpop.f32.mrf.mxu1 }
 0x18c   : > { %v1061_v47 = vpop.f32.mrf.mxu0 }
 0x18d   : > { %v1205_v48 = vpop.f32.mrf.mxu1  ;;  %v1104_v47 = vadd.f32 %v1057_v43, %v2986_v35 }
 0x18e   : > { %v1062_v49 = vpop.f32.mrf.mxu0  ;;  %v1213_v44 = vadd.f32 %v1205_v48, %v2990_v6 }
 0x18f   : > { %v2461_v50 = vpop.f32.mrf.mxu1 }
 0x190   : > { %v1164_v51 = vpop.f32.mrf.mxu0 }
 0x191   : > { %v1208_v52 = vpop.f32.mrf.mxu1 }
 0x192   : > { %v1166_v53 = vpop.f32.mrf.mxu0 }
 0x193   : > { %v2462_v54 = vpop.f32.mrf.mxu1 }
 0x194   : > { %v1168_v55 = vpop.f32.mrf.mxu0  ;;  %v1105_v54 = vadd.f32 %v2992_v45, %v2988_v37 }
 0x195   : > { %v1327_v56 = vpop.f32.mrf.mxu1  ;;  %v1211_v55 = vadd.f32 %v1164_v51, %v1104_v47 }
 0x196   : > { %v1169_v57 = vpop.f32.mrf.mxu0  ;;  %v1335_v50 = vadd.f32 %v1327_v56, %v1213_v44 }
 0x197   : > { %v2467_v58 = vpop.f32.mrf.mxu1 }
 0x198   : > { %v1286_v59 = vpop.f32.mrf.mxu0 }
 0x199   : > { %v1330_v60 = vpop.f32.mrf.mxu1 }
 0x19a   : > { %v1288_v61 = vpop.f32.mrf.mxu0 }
 0x19b   : > { %v2468_v62 = vpop.f32.mrf.mxu1 }
 0x19c   : > { %v1290_v63 = vpop.f32.mrf.mxu0  ;;  %v1212_v62 = vadd.f32 %v1166_v53, %v1105_v54 }
 0x19d   : > { %v1433_v0 = vpop.f32.mrf.mxu1  ;;  %v1333_v63 = vadd.f32 %v1286_v59, %v1211_v55 }
 0x19e   : > { %v1291_v1 = vpop.f32.mrf.mxu0  ;;  %v1441_v58 = vadd.f32 %v1433_v0, %v1335_v50 }
 0x19f   : > { %v2473_v2 = vpop.f32.mrf.mxu1 }
 0x1a0   : > { %v1392_v5 = vpop.f32.mrf.mxu0 }
 0x1a1   : > { %v1436_v7 = vpop.f32.mrf.mxu1  ;;  %v1439_v6 = vadd.f32 %v1392_v5, %v1333_v63 }
 0x1a2   : > { %v1394_v8 = vpop.f32.mrf.mxu0 }
 0x1a3   : > { %v2474_v9 = vpop.f32.mrf.mxu1 }
 0x1a4   : > { %v1396_v10 = vpop.f32.mrf.mxu0  ;;  %v1334_v9 = vadd.f32 %v1288_v61, %v1212_v62 }
 0x1a5   : > { %v1539_v11 = vpop.f32.mrf.mxu1 }
 0x1a6   : > { %v1397_v12 = vpop.f32.mrf.mxu0  ;;  %v1547_v2 = vadd.f32 %v1539_v11, %v1441_v58  ;;  %v1440_v43 = vadd.f32 %v1394_v8, %v1334_v9 }
 0x1a7   : > { %v2479_v13 = vpop.f32.mrf.mxu1 }
 0x1a8   : > { %v1498_v14 = vpop.f32.mrf.mxu0 }
 0x1a9   : > { %v1542_v18 = vpop.f32.mrf.mxu1  ;;  %v1545_v56 = vadd.f32 %v1498_v14, %v1439_v6 }
 0x1aa   : > { %v1500_v19 = vpop.f32.mrf.mxu0 }
 0x1ab   : > { %v2480_v20 = vpop.f32.mrf.mxu1  ;;  %v1546_v37 = vadd.f32 %v1500_v19, %v1440_v43 }
 0x1ac   : > { %v1502_v21 = vpop.f32.mrf.mxu0 }
 0x1ad   : > { %v1645_v22 = vpop.f32.mrf.mxu1 }
 0x1ae   : > { %v1503_v23 = vpop.f32.mrf.mxu0  ;;  %v1653_v10 = vadd.f32 %v1645_v22, %v1547_v2 }
 0x1af   : > { %v2485_v24 = vpop.f32.mrf.mxu1 }
 0x1b0   : > { %v1604_v25 = vpop.f32.mrf.mxu0 }
 0x1b1   : > { %v1648_v26 = vpop.f32.mrf.mxu1  ;;  %v1651_v45 = vadd.f32 %v1604_v25, %v1545_v56 }
 0x1b2   : > { %v1606_v27 = vpop.f32.mrf.mxu0 }
 0x1b3   : > { %v2486_v28 = vpop.f32.mrf.mxu1  ;;  %v1652_v53 = vadd.f32 %v1606_v27, %v1546_v37 }
 0x1b4   : > { %v1608_v29 = vpop.f32.mrf.mxu0 }
 0x1b5   : > { %v1751_v30 = vpop.f32.mrf.mxu1  ;;  %v2188_v29 = vpop.permute.xlu0 %2187 }
 0x1b6   : > { %v1609_v31 = vpop.f32.mrf.mxu0  ;;  %v1759_v13 = vadd.f32 %v1751_v30, %v1653_v10 }
 0x1b7   : > { %v2491_v32 = vpop.f32.mrf.mxu1 }
 0x1b8   : > { %v1710_v33 = vpop.f32.mrf.mxu0 }
 0x1b9   : > { %v1754_v16 = vpop.f32.mrf.mxu1  ;;  %v1757_v59 = vadd.f32 %v1710_v33, %v1651_v45 }
 0x1ba   : > { %v1712_v17 = vpop.f32.mrf.mxu0  ;;  %v2561_v16 = vmov 1983009808  }
 0x1bb   : > { %v2492_v15 = vpop.f32.mrf.mxu1  ;;  %v1758_v61 = vadd.f32 %v1712_v17, %v1652_v53  ;;  %v2204_v27 = vunpack.c.l.s4 %v2561_v16 }
 0x1bc   : > { %v1714_v34 = vpop.f32.mrf.mxu0 }
 0x1bd   : > { %v1857_v36 = vpop.f32.mrf.mxu1 }
 0x1be   : > { %v1715_v3 = vpop.f32.mrf.mxu0  ;;  %v1865_v0 = vadd.f32 %v1857_v36, %v1759_v13 }
 0x1bf   : > { %v2497_v38 = vpop.f32.mrf.mxu1 }
 0x1c0   : > { %v1816_v39 = vpop.f32.mrf.mxu0  ;;  %v2205_v38 = vunpack.c.0.s8 %v2204_v27 }
 0x1c1   : > { %v1860_v40 = vpop.f32.mrf.mxu1  ;;  %v1863_v5 = vadd.f32 %v1816_v39, %v1757_v59 }
 0x1c2   : > { %v1818_v41 = vpop.f32.mrf.mxu0 }
 0x1c3   : > { %v2498_v42 = vpop.f32.mrf.mxu1  ;;  %v1864_v8 = vadd.f32 %v1818_v41, %v1758_v61 }
 0x1c4   : > { %v1820_v46 = vpop.f32.mrf.mxu0 }
 0x1c5   : > { %v1963_v49 = vpop.f32.mrf.mxu1 }
 0x1c6   : > { %v1821_v52 = vpop.f32.mrf.mxu0  ;;  %v1971_v11 = vadd.f32 %v1963_v49, %v1865_v0  ;;  %v2208_v49 = vsub.s32 %v2205_v38, %v2603_v4 }
 0x1c7   : > { %v2503_v57 = vpop.f32.mrf.mxu1 }
 0x1c8   : > { %v1922_v60 = vpop.f32.mrf.mxu0 }
 0x1c9   : > { %v1966_v1 = vpop.f32.mrf.mxu1  ;;  %v1969_v14 = vadd.f32 %v1922_v60, %v1863_v5 }
 0x1ca   : > { %v1924_v7 = vpop.f32.mrf.mxu0 }
 0x1cb   : > { %v2504_v48 = vpop.f32.mrf.mxu1  ;;  %v1970_v25 = vadd.f32 %v1924_v7, %v1864_v8 }
 0x1cc   : > { %v1926_v35 = vpop.f32.mrf.mxu0 }
 0x1cd   : > { %v2069_v12 = vpop.f32.mrf.mxu1 }
 0x1ce   : > { %v1927_v18 = vpop.f32.mrf.mxu0  ;;  %v2077_v22 = vadd.f32 %v2069_v12, %v1971_v11 }
 0x1cf   : > { %v2509_v51 = vpop.f32.mrf.mxu1 }
 0x1d0   : > { %v2028_v20 = vpop.f32.mrf.mxu0 }
 0x1d1   : > { %v2072_v21 = vpop.f32.mrf.mxu1  ;;  %v2075_v31 = vadd.f32 %v2028_v20, %v1969_v14 }
 0x1d2   : > { %v2030_v23 = vpop.f32.mrf.mxu0 }
 0x1d3   : > { %v2510_v24 = vpop.f32.mrf.mxu1  ;;  %v2076_v34 = vadd.f32 %v2030_v23, %v1970_v25 }
 0x1d4   : > { %v2032_v26 = vpop.f32.mrf.mxu0 }
 0x1d5   : > { %v2175_v28 = vpop.f32.mrf.mxu1 }
 0x1d6   : > { %v2183_v30 = vadd.f32 %v2175_v28, %v2077_v22  ;;  %v2033_v19 = vpop.f32.mrf.mxu0 }
 0x1d7   : > { %v2515_v32 = vpop.f32.mrf.mxu1 }
 0x1d8   : > { %v2192_v33 = vadd.f32 %v2188_v29, %v2183_v30  ;;  %v2134_v15 = vpop.f32.mrf.mxu0 }
 0x1d9   : > { %v2181_v36 = vadd.f32 %v2134_v15, %v2075_v31  ;;  %v2178_v17 = vpop.f32.mrf.mxu1 }
 0x1da   : > { %v2136_v3 = vpop.f32.mrf.mxu0  ;;  %v2195_v39 = vmax.f32 %v2192_v33, 0.0 }
 0x1db   : > { %v2190_v40 = vadd.f32 %v2188_v29, %v2181_v36  ;;  %v2182_v41 = vadd.f32 %v2136_v3, %v2076_v34  ;;  %v2516_v42 = vpop.f32.mrf.mxu1 }
 0x1dc   : > { %v2138_v44 = vpop.f32.mrf.mxu0  ;;  %v2198_v50 = vpack.c.bf16 %v2195_v39, %v2195_v39 }
 0x1dd   : > { %v2191_v46 = vadd.f32 %v2188_v29, %v2182_v41  ;;  %v2193_v52 = vmax.f32 %v2190_v40, 0.0 }
 0x1de   : > { %v2139_v47 = vpop.f32.mrf.mxu0  ;;  %v2216_v57 = vrot.slane %v2198_v50, %v2208_v49 }
 0x1df   : > { %v2194_v54 = vmax.f32 %v2191_v46, 0.0 }
 0x1e1   : > { %v2370_v55 = vpack.c.bf16 %v2194_v54, %v2193_v52 }
 0x1e3   : > { %v2209_v58 = vrot.slane %v2370_v55, %v2208_v49 }
 0x1e5   : > { %v2217_v60 = vcombine.low %v2209_v58, %v2216_v57 }
 0x1e7   : > { %2224 = vst.msk [vmem:[%s238_s30] sm:$0x3f] %vm2223_vm15, %v2217_v60 }
 0x1e8 PF: > { %s15_s18 = sadd.s32 1, %s2547_s18  }
 0x1e9   : > { %p12_p4 = scmp.ge.s32.totalorder %s15_s18, 4  }
 0x1eb   :  { %14 = sbr.rel (!%p12_p4) target bundleno = 1 (0x1), region = 89 }

</bundles_post_ra>
